<compile_context>
chip_gen: v7x
topology: tpu7x:2x2x1
jax: 0.10.0
libtpu: 0.0.40
codegen_flags: <defaults>
</compile_context>

<pallas_src>
import jax
import jax.numpy as jnp
from jax.experimental import pallas as pl
from jax.experimental.pallas import tpu as pltpu

H = 768          # hidden size hardcoded by the PyTorch module (Linear(2, 768), Linear(768, P*2))
P = 64           # predicate2id_num (chosen so P*2 = 128 keeps the output lane-dense)
P2 = P * 2
TS_MAX = 256     # sequence tile: multiple of 256 (v6e/v7x MXU M) and of 128 (v5e)


def object_head_kernel(enc_ref, wobj_ref, bias_ref, out_ref):
    """y = enc_tile(bf16) @ W_obj^T(bf16) (f32 acc) + per-batch bias; out = sigmoid(y)**4."""
    y = jnp.dot(enc_ref[...], wobj_ref[...],
                preferred_element_type=jnp.float32)          # (TS, P2) f32 on MXU
    y = y + bias_ref[...]                                    # + (1, P2) broadcast (VPU)
    s = jax.nn.sigmoid(y)                                    # EUP
    s2 = s * s
    out_ref[...] = s2 * s2                                   # sigmoid(y) ** 4


@jax.jit
def object_head(enc_out, subject_position, w_sp_t, b_sp, w_obj_t, b_obj):
    B, S, _ = enc_out.shape
    ts = TS_MAX if S >= TS_MAX else S          # small S: one full-seq tile (always legal)

    # Fold the subject projection into a per-batch output bias (tiny XLA ops):
    #   (enc + subj) @ W_obj + b_obj == enc @ W_obj + (subj @ W_obj + b_obj)
    subj = subject_position @ w_sp_t + b_sp                    # (B, H)    f32
    obj_bias = (subj @ w_obj_t + b_obj)[:, None, :]            # (B, 1, P2) f32

    # bf16 for the HBM-dominant operands; f32 accumulation inside the kernel.
    enc_bf16 = enc_out.astype(jnp.bfloat16)
    w_obj_bf16 = w_obj_t.astype(jnp.bfloat16)

    grid = (B, pl.cdiv(S, ts))                 # ragged tail block masked by Pallas
    out = pl.pallas_call(
        object_head_kernel,
        out_shape=jax.ShapeDtypeStruct((B, S, P2), jnp.float32),
        grid_spec=pltpu.PrefetchScalarGridSpec(
            num_scalar_prefetch=0,
            grid=grid,
            in_specs=[
                # encoder output tile (batch dim squeezed -> kernel sees (ts, H))
                pl.BlockSpec((pl.Squeezed(), ts, H), lambda b, s: (b, s, 0)),
                # W_obj^T: constant index_map -> DMA'd once, not re-fetched per step
                pl.BlockSpec((H, P2), lambda b, s: (0, 0)),
                # per-batch fused bias (subj @ W_obj + b_obj), kernel sees (1, P2)
                pl.BlockSpec((pl.Squeezed(), 1, P2), lambda b, s: (b, 0, 0)),
            ],
            out_specs=pl.BlockSpec((pl.Squeezed(), ts, P2), lambda b, s: (b, s, 0)),
        ),
        compiler_params=pltpu.CompilerParams(
            dimension_semantics=("parallel", "parallel")),
    )(enc_bf16, w_obj_bf16, obj_bias)
    # reshape (B, S, P*2) -> (B, S, P, 2) as in torch.reshape (elementwise ops commute)
    return out.reshape(B, S, P, 2)


def synthetic_encoder(params, input_ids, attention_mask=None):
    # TODO(synk): the real `subject_model` is an external pretrained encoder (e.g. BERT);
    # here a deterministic synthetic stand-in: embedding lookup + subject head in plain JAX.
    output = params["emb"][input_ids]                                            # (B, S, H)
    subject_out = jax.nn.sigmoid(output @ params["w_subj"] + params["b_subj"])   # (B, S, 2)
    return output, subject_out


def object_model_forward(params, input_ids, subject_position, attention_mask=None):
    output, subject_out = synthetic_encoder(params, input_ids, attention_mask)
    object_out = object_head(
        output, subject_position.astype(jnp.float32),
        params["w_sp_t"], params["b_sp"], params["w_obj_t"], params["b_obj"])
    return subject_out, object_out


def reference_forward_f32(params, input_ids, subject_position):
    """Original module semantics, all f32."""
    output, subject_out = synthetic_encoder(params, input_ids, None)
    subj = subject_position @ params["w_sp_t"] + params["b_sp"]                  # (B, H)
    y = (output + subj[:, None, :]) @ params["w_obj_t"] + params["b_obj"][0]
    y = y.reshape(y.shape[0], y.shape[1], P, 2)
    return subject_out, jnp.power(jax.nn.sigmoid(y), 4)


def reference_forward_matched(params, input_ids, subject_position):
    """Plain-JAX reference with the same bf16 operand rounding as the kernel."""
    output, subject_out = synthetic_encoder(params, input_ids, None)
    subj = subject_position @ params["w_sp_t"] + params["b_sp"]                  # (B, H)
    obj_bias = subj @ params["w_obj_t"] + params["b_obj"]                        # (B, P2)
    y = jnp.einsum("bsh,hp->bsp",
                   output.astype(jnp.bfloat16),
                   params["w_obj_t"].astype(jnp.bfloat16),
                   preferred_element_type=jnp.float32) + obj_bias[:, None, :]
    y = y.reshape(y.shape[0], y.shape[1], P, 2)
    return subject_out, jnp.power(jax.nn.sigmoid(y), 4)


if __name__ == "__main__":
    # Small but representative shapes: B=2, S=320 (= 256 + 64, so the ragged
    # last seq tile is exercised), hidden H=768 fixed by the module.
    B, S, VOCAB = 2, 320, 32
    key = jax.random.PRNGKey(0)
    k = jax.random.split(key, 8)

    params = {
        # synthetic stand-in encoder params
        "emb":    jax.random.normal(k[0], (VOCAB, H), jnp.float32) * 0.05,
        "w_subj": jax.random.normal(k[1], (H, 2), jnp.float32) * 0.05,
        "b_subj": jax.random.normal(k[2], (2,), jnp.float32) * 0.05,
        # dense_subject_position: nn.Linear(2, 768) -> transposed weight (2, 768)
        "w_sp_t": jax.random.normal(k[3], (2, H), jnp.float32) * 0.05,
        "b_sp":   jax.random.normal(k[4], (1, H), jnp.float32) * 0.05,
        # dense_object: nn.Linear(768, P*2) -> transposed weight (768, P*2)
        "w_obj_t": jax.random.normal(k[5], (H, P2), jnp.float32) * 0.02,
        "b_obj":   jax.random.normal(k[6], (1, P2), jnp.float32) * 0.02,
    }

    input_ids = jax.random.randint(k[7], (B, S), 0, VOCAB, jnp.int32)
    subject_position = jax.random.uniform(
        jax.random.fold_in(key, 99), (B, 2), jnp.float32) * 8.0

    subject_out, object_out = object_model_forward(params, input_ids, subject_position)
    jax.block_until_ready(object_out)

    # 1) tight check vs a plain-JAX reference using the same bf16 operand rounding
    ref_subject_out, ref_matched = reference_forward_matched(params, input_ids, subject_position)
    # 2) loose check vs the full-f32 reference (original module semantics)
    _, ref_f32 = reference_forward_f32(params, input_ids, subject_position)

    assert object_out.shape == (B, S, P, 2), object_out.shape
    assert subject_out.shape == (B, S, 2), subject_out.shape
    assert jnp.allclose(object_out, ref_matched, atol=1e-4, rtol=1e-4)
    assert jnp.allclose(object_out, ref_f32, atol=2e-3, rtol=2e-3)

    print("KERNEL_OK")
</pallas_src>

<mosaic_0001>
module attributes {stable_mosaic.version = 11 : i64} {
  func.func @object_head_kernel(%arg0: i32, %arg1: i32, %arg2: memref<1x256x768xbf16, #tpu.memory_space<vmem>>, %arg3: memref<768x128xbf16, #tpu.memory_space<vmem>>, %arg4: memref<1x1x128xf32, #tpu.memory_space<vmem>>, %arg5: memref<1x256x128xf32, #tpu.memory_space<vmem>>) attributes {dimension_semantics = [#tpu.dimension_semantics<parallel>, #tpu.dimension_semantics<parallel>], iteration_bounds = array<i64: 2, 2>, scalar_prefetch = 0 : i64, scratch_operands = 0 : i64, tpu.core_type = #tpu.core_type<tc>, window_params = [{transform_indices = @transform_0, window_bounds = array<i64: 1, 256, 768>}, {pipeline_mode = #tpu.pipeline_mode<synchronous>, transform_indices = @transform_1, window_bounds = array<i64: 768, 128>}, {transform_indices = @transform_2, window_bounds = array<i64: 1, 1, 128>}, {transform_indices = @transform_3, window_bounds = array<i64: 1, 256, 128>}]} {
    %c0 = arith.constant 0 : index
    %c0_0 = arith.constant 0 : index
    %c0_1 = arith.constant 0 : index
    %0 = vector.load %arg2[%c0, %c0_0, %c0_1] : memref<1x256x768xbf16, #tpu.memory_space<vmem>>, vector<1x256x768xbf16>
    %1 = vector.shape_cast %0 : vector<1x256x768xbf16> to vector<256x768xbf16>
    %c0_2 = arith.constant 0 : index
    %c0_3 = arith.constant 0 : index
    %2 = vector.load %arg3[%c0_2, %c0_3] : memref<768x128xbf16, #tpu.memory_space<vmem>>, vector<768x128xbf16>
    %cst = arith.constant dense<0.000000e+00> : vector<256x128xf32>
    %3 = tpu.matmul %1, %2, %cst {dimension_numbers = #tpu.dot_dimension_numbers<[1], [0], [0], [1], [0, 0, 1, 1], [], []>} : vector<256x768xbf16>, vector<768x128xbf16>, vector<256x128xf32> -> vector<256x128xf32>
    %c0_4 = arith.constant 0 : index
    %c0_5 = arith.constant 0 : index
    %c0_6 = arith.constant 0 : index
    %4 = vector.load %arg4[%c0_4, %c0_5, %c0_6] : memref<1x1x128xf32, #tpu.memory_space<vmem>>, vector<1x1x128xf32>
    %5 = vector.shape_cast %4 : vector<1x1x128xf32> to vector<1x128xf32>
    %6 = vector.broadcast %5 : vector<1x128xf32> to vector<256x128xf32>
    %7 = arith.addf %3, %6 : vector<256x128xf32>
    %8 = arith.negf %7 : vector<256x128xf32>
    %9 = math.exp %8 : vector<256x128xf32>
    %cst_7 = arith.constant 1.000000e+00 : f32
    %10 = vector.broadcast %cst_7 : f32 to vector<256x128xf32>
    %11 = arith.addf %10, %9 : vector<256x128xf32>
    %12 = arith.divf %10, %11 : vector<256x128xf32>
    %13 = arith.mulf %12, %12 : vector<256x128xf32>
    %14 = arith.mulf %13, %13 : vector<256x128xf32>
    %c0_8 = arith.constant 0 : index
    %c0_9 = arith.constant 0 : index
    %c0_10 = arith.constant 0 : index
    %15 = vector.load %arg5[%c0_8, %c0_9, %c0_10] : memref<1x256x128xf32, #tpu.memory_space<vmem>>, vector<1x256x128xf32>
    %16 = vector.shape_cast %15 : vector<1x256x128xf32> to vector<256x128xf32>
    %17 = vector.shape_cast %14 : vector<256x128xf32> to vector<1x256x128xf32>
    tpu.vector_store %arg5[%c0_8, %c0_9, %c0_10], %17 {strides = array<i32>} : memref<1x256x128xf32, #tpu.memory_space<vmem>>, vector<1x256x128xf32>,
    return
  }
  func.func @transform_0(%arg0: i32, %arg1: i32) -> (i32, i32, i32) {
    %c0_i32 = arith.constant 0 : i32
    %c0_i32_0 = arith.constant 0 : i32
    return %arg0, %arg1, %c0_i32 : i32, i32, i32
  }
  func.func @transform_1(%arg0: i32, %arg1: i32) -> (i32, i32) {
    %c0_i32 = arith.constant 0 : i32
    %c0_i32_0 = arith.constant 0 : i32
    %c0_i32_1 = arith.constant 0 : i32
    return %c0_i32, %c0_i32_0 : i32, i32
  }
  func.func @transform_2(%arg0: i32, %arg1: i32) -> (i32, i32, i32) {
    %c0_i32 = arith.constant 0 : i32
    %c0_i32_0 = arith.constant 0 : i32
    %c0_i32_1 = arith.constant 0 : i32
    return %arg0, %c0_i32, %c0_i32_0 : i32, i32, i32
  }
  func.func @transform_3(%arg0: i32, %arg1: i32) -> (i32, i32, i32) {
    %c0_i32 = arith.constant 0 : i32
    %c0_i32_0 = arith.constant 0 : i32
    return %arg0, %arg1, %c0_i32 : i32, i32, i32
  }
}

</mosaic_0001>

<bundles_post_ra>
// kernel: object_head.1
= control target key start
LH: loop header
LB: loop body
LE: loop exit
PB: predicated region body
PF: predicated region fallthrough
CT: control target
= control target key end

     0   :  { %s3493_s12 = smov 0   ;;  %s3495_s13 = smov 0   ;;  %s4124_s0 = inlined_call_operand.vmem [shape: bf16[2,320,768], index: 0, kind: input, shape index: {}]   ;;  %s4125_s1 = inlined_call_operand.vmem [shape: bf16[768,128], index: 1, kind: input, shape index: {}]   ;;  %s4126_s2 = inlined_call_operand.vmem [shape: f32[2,1,128], index: 2, kind: input, shape index: {}]   ;;  %s4127_s3 = inlined_call_operand.vmem [shape: f32[2,320,128], index: 3, kind: output, shape index: {}]  }
   0x1   :  { %s3497_s14 = smov 0   ;;  %s3499_s15 = smov 0  }
   0x2   :  { %s3501_s16 = smov 0   ;;  %s3503_s17 = smov 0  }
   0x3   :  { %s3505_s18 = smov 0  }
   0x4 LB: > { %s22_s19 = sadd.s32 1, %s3431_s16  ;;  %s25_s20 = sadd.s32 1, %s3435_s17  ;;  %s3439_s18 = sphi %s3505_s18, %s13_s18   ;;  %s3435_s17 = sphi %s3503_s17, %s4139_s17   ;;  %s3431_s16 = sphi %s3501_s16, %s4138_s16   ;;  %s3427_s15 = sphi %s3499_s15, %s4137_s15   ;;  %s3423_s14 = sphi %s3497_s14, %s4136_s14   ;;  %s3419_s13 = sphi %s3495_s13, %s4135_s13   ;;  %s3415_s12 = sphi %s3493_s12, %s4134_s12  }
   0x5   : > { %p23_p0 = scmp.ge.s32.totalorder %s22_s19, 2  ;;  %s2354_s21 = sadd.s32 4294967295, %s3439_s18  }
   0x6   : > { %p119_p1 = scmp.ne.s32.totalorder %s3419_s13, %s3415_s12  ;;  %p120_p2 = scmp.eq.s32.totalorder %s2354_s21, 3 }
   0x7   : > { %s4141_s19 = smov (%p23_p0, %s22_s19), 0  ;;  %s4143_s20 = smov (!%p23_p0, %s25_s20), %s3435_s17 }
   0x8   : > { %s105_s22 = ssub.s32 %s3431_s16, %s4141_s19  ;;  %p27_p3 = scmp.ge.s32.totalorder %s4143_s20, 2 }
   0x9   : > { %p2358_p4 = scmp.ge.s32.totalorder %s3439_s18, 1  ;;  %p3537_p5 = por %p120_p2, %p119_p1 }
   0xa   : > { %p177_p6 = scmp.lt.s32.totalorder %s3439_s18, 5  ;;  %s4145_s20 = smov (%p27_p3, %s4143_s20), 0 }
   0xb   : > { %s104_s24 = ssub.s32 %s3435_s17, %s4145_s20  ;;  %s109_s26 = sadd.s32 1, %s3419_s13 }
   0xc   : > { %p178_p7 = pnand %p2358_p4, %p177_p6  ;;  %s106_s25 = sor.u32 %s105_s22, %s104_s24 }
   0xd   : > { %p107_p8 = scmp.eq.s32.totalorder %s106_s25, 0  ;;  %v3033_v0 = vld [vmem:[%s4125_s1 + $0x40] sm:$0xff] (!%p178_p7)   ;;  %s3553_s30 = sshll.u32 (!%p178_p7), %s3423_s14, 5  ;;  %v3035_v2 = vld [vmem:[%s4125_s1 + $0x48] sm:$0xff] (!%p178_p7)   ;;  %v3037_v4 = vld [vmem:[%s4125_s1 + $0x50] sm:$0xff] (!%p178_p7)  }
   0xe   : > { %181 = sbr.rel (%p178_p7) target bundleno = 539 (0x21b), region = 32  ;;  %v3034_v1 = vld [vmem:[%s4125_s1] sm:$0xff] (!%p178_p7)   ;;  %p219_p9 = scmp.lt.s32.totalorder (!%p178_p7), %s3427_s15, 1  ;;  %2558 = vmatprep.subr.bf16.mxu0 (!%p178_p7), %v3033_v0  ;;  %2894 = vmatprep.subr.bf16.mxu1 (!%p178_p7), %v3033_v0  ;;  %v3036_v3 = vld [vmem:[%s4125_s1 + $0x8] sm:$0xff] (!%p178_p7)   ;;  %v3038_v5 = vld [vmem:[%s4125_s1 + $0x10] sm:$0xff] (!%p178_p7)  }
   0xf   : > { %s3548_s27 = scalar_select %p107_p8, %s3419_s13, %s109_s26  }
  0x10   : > { %p221_p10 = scmp.lt.s32.totalorder (!%p178_p7), %s3553_s30, 39  ;;  %2559 = vmatpush3.bf16.msra.mxu0 (!%p178_p7), %v3034_v1  ;;  %2902 = vmatpush3.bf16.msra.mxu1 (!%p178_p7), %v3034_v1  ;;  %v3039_v6 = vld [vmem:[%s4125_s1 + $0x58] sm:$0xff] (!%p178_p7)   ;;  %v3041_v8 = vld [vmem:[%s4125_s1 + $0x60] sm:$0xff] (!%p178_p7)   ;;  %v3043_v10 = vld [vmem:[%s4125_s1 + $0x68] sm:$0xff] (!%p178_p7)  }
  0x11   : > { %2560 = vmatprep.subr.bf16.mxu0 (!%p178_p7), %v3035_v2  ;;  %2895 = vmatprep.subr.bf16.mxu1 (!%p178_p7), %v3035_v2  ;;  %v3040_v7 = vld [vmem:[%s4125_s1 + $0x18] sm:$0xff] (!%p178_p7)   ;;  %v3042_v9 = vld [vmem:[%s4125_s1 + $0x20] sm:$0xff] (!%p178_p7)   ;;  %v3044_v13 = vld [vmem:[%s4125_s1 + $0x28] sm:$0xff] (!%p178_p7)  }
  0x12   : > { %v3045_v14 = vld [vmem:[%s4125_s1 + $0x70] sm:$0xff] (!%p178_p7)   ;;  %v3047_v16 = vld [vmem:[%s4125_s1 + $0x78] sm:$0xff] (!%p178_p7)   ;;  %v3055_v18 = vld [vmem:[%s4125_s1 + $0xc0] sm:$0xff] (!%p178_p7)  }
  0x13   : > { %v3046_v15 = vld [vmem:[%s4125_s1 + $0x30] sm:$0xff] (!%p178_p7)   ;;  %v3048_v17 = vld [vmem:[%s4125_s1 + $0x38] sm:$0xff] (!%p178_p7)   ;;  %v3057_v20 = vld [vmem:[%s4125_s1 + $0x140] sm:$0xff] (!%p178_p7)  }
  0x14   : > { %2561 = vmatpush3.bf16.msra.mxu0 (!%p178_p7), %v3036_v3  ;;  %2903 = vmatpush3.bf16.msra.mxu1 (!%p178_p7), %v3036_v3  ;;  %v3056_v22 = vld [vmem:[%s4125_s1 + $0x80] sm:$0xff] (!%p178_p7)   ;;  %v3065_v26 = vld [vmem:[%s4125_s1 + $0xc8] sm:$0xff] (!%p178_p7)   ;;  %v3075_v30 = vld [vmem:[%s4125_s1 + $0xd0] sm:$0xff] (!%p178_p7)  }
  0x15   : > { %s3567_s10 = scalar_select %p219_p9, %s3427_s15, 1  ;;  %2562 = vmatprep.subr.bf16.mxu0 %v3037_v4  ;;  %2896 = vmatprep.subr.bf16.mxu1 %v3037_v4  ;;  %v3058_v23 = vld [vmem:[%s4125_s1 + $0x100] sm:$0xff]   ;;  %v3066_v27 = vld [vmem:[%s4125_s1 + $0x88] sm:$0xff]   ;;  %v3077_v33 = vld [vmem:[%s4125_s1 + $0x150] sm:$0xff]  }
  0x16   : > { %s222_s21 = scalar_select %p221_p10, %s3553_s30, 39  ;;  %v3067_v28 = vld [vmem:[%s4125_s1 + $0x148] sm:$0xff]   ;;  %v3076_v36 = vld [vmem:[%s4125_s1 + $0x90] sm:$0xff]   ;;  %v3085_v38 = vld [vmem:[%s4125_s1 + $0xd8] sm:$0xff]  }
  0x17   : > { %s2911_s22 = smul.u32 240, %s3567_s10  ;;  %v3068_v29 = vld [vmem:[%s4125_s1 + $0x108] sm:$0xff]   ;;  %v3078_v37 = vld [vmem:[%s4125_s1 + $0x110] sm:$0xff]   ;;  %v3087_v39 = vld [vmem:[%s4125_s1 + $0x158] sm:$0xff]   ;;  %s236_s8 = scalar_lea.vmem %s4126_s2, %s3567_s10 }
  0x18   : > { %s2910_s24 = smul.u32 6, %s222_s21  ;;  %2563 = vmatpush3.bf16.msra.mxu0 %v3038_v5  ;;  %2904 = vmatpush3.bf16.msra.mxu1 %v3038_v5  ;;  %v3086_v42 = vld [vmem:[%s4125_s1 + $0x98] sm:$0xff]   ;;  %v3095_v46 = vld [vmem:[%s4125_s1 + $0xe0] sm:$0xff]   ;;  %v3105_v52 = vld [vmem:[%s4125_s1 + $0xe8] sm:$0xff]   ;;  %s210_s10 = sand.u32 1, %s3415_s12  }
  0x19   : > { %2564 = vmatprep.subr.bf16.mxu0 %v3039_v6  ;;  %2897 = vmatprep.subr.bf16.mxu1 %v3039_v6  ;;  %v3088_v43 = vld [vmem:[%s4125_s1 + $0x118] sm:$0xff]   ;;  %v3096_v47 = vld [vmem:[%s4125_s1 + $0xa0] sm:$0xff]   ;;  %v3106_v55 = vld [vmem:[%s4125_s1 + $0xa8] sm:$0xff]   ;;  %s1989_s9 = ssub.s32 (%p3537_p5), 40, %s3553_s30  ;;  %s2912_s11 = smul.u32 (%p3537_p5), 40, %s3427_s15 }
  0x1a   : > { %s225_s4 = sadd.s32 %s2911_s22, %s2910_s24  ;;  %v3097_v48 = vld [vmem:[%s4125_s1 + $0x160] sm:$0xff]   ;;  %v3107_v56 = vld [vmem:[%s4125_s1 + $0x168] sm:$0xff]   ;;  %v3115_v58 = vld [vmem:[%s4125_s1 + $0xf0] sm:$0xff]   ;;  %p1990_p11 = scmp.lt.s32.totalorder (%p3537_p5), %s1989_s9, 32 }
  0x1b   : > { %s2361_s7 = sshll.u32 %s225_s4, 2  ;;  %v3098_v49 = vld [vmem:[%s4125_s1 + $0x120] sm:$0xff]   ;;  %v3108_v57 = vld [vmem:[%s4125_s1 + $0x128] sm:$0xff]   ;;  %v3116_v61 = vld [vmem:[%s4125_s1 + $0xb0] sm:$0xff]   ;;  %s1995_s14 = sadd.s32 (%p3537_p5), %s2912_s11, %s3553_s30 }
  0x1c   : > { %s3589_s21 = scalar_lea.vmem %s4124_s0, %s2361_s7  ;;  %2565 = vmatpush3.bf16.msra.mxu0 %v3040_v7  ;;  %2905 = vmatpush3.bf16.msra.mxu1 %v3040_v7  ;;  %v3117_v63 = vld [vmem:[%s4125_s1 + $0x170] sm:$0xff]   ;;  %v3125_v2 = vld [vmem:[%s4125_s1 + $0xf8] sm:$0xff]   ;;  %s2543_s22 = sshll.u32 (%p3537_p5), %s1995_s14, 3 }
  0x1d   : > { %2566 = vmatprep.subr.bf16.mxu0 %v3041_v8  ;;  %2898 = vmatprep.subr.bf16.mxu1 %v3041_v8  ;;  %v3051_v11 = vld [vmem:[%s3589_s21 + $0x4] ss:$24 sps:$4 sm:$0xff]   ;;  %v3049_v19 = vld [vmem:[%s3589_s21] ss:$24 sps:$4 sm:$0xff]   ;;  %v3059_v24 = vld [vmem:[%s3589_s21 + $0x34] ss:$24 sps:$4 sm:$0xff]   ;;  %s3984_s28 = scalar_lea.vmem (%p3537_p5), %s4127_s3, %s2543_s22  }
  0x1e   : > { %v3054_v12 = vld [vmem:[%s3589_s21 + $0x184] ss:$24 sps:$4 sm:$0xff]   ;;  %1242 = vmatprep.mubr.bf16.mxu0 %v3051_v11  ;;  %v3052_v21 = vld [vmem:[%s3589_s21 + $0x180] ss:$24 sps:$4 sm:$0xff]   ;;  %v3061_v25 = vld [vmem:[%s3589_s21 + $0x1b4] ss:$24 sps:$4 sm:$0xff]  }
  0x1f   : > { %1306 = vmatprep.mubr.bf16.mxu1 %v3054_v12  ;;  %v3063_v31 = vld [vmem:[%s3589_s21 + $0x30] ss:$24 sps:$4 sm:$0xff]   ;;  %v3069_v34 = vld [vmem:[%s3589_s21 + $0x64] ss:$24 sps:$4 sm:$0xff]   ;;  %v3073_v40 = vld [vmem:[%s3589_s21 + $0x60] ss:$24 sps:$4 sm:$0xff]  }
  0x20   : > { %2567 = vmatpush3.bf16.msra.mxu0 %v3042_v9  ;;  %2906 = vmatpush3.bf16.msra.mxu1 %v3042_v9  ;;  %v3064_v32 = vld [vmem:[%s3589_s21 + $0x1b0] ss:$24 sps:$4 sm:$0xff]   ;;  %v3071_v35 = vld [vmem:[%s3589_s21 + $0x1e4] ss:$24 sps:$4 sm:$0xff]   ;;  %v3074_v41 = vld [vmem:[%s3589_s21 + $0x1e0] ss:$24 sps:$4 sm:$0xff]  }
  0x21   : > { %2568 = vmatprep.subr.bf16.mxu0 %v3043_v10  ;;  %2899 = vmatprep.subr.bf16.mxu1 %v3043_v10  ;;  %v3079_v44 = vld [vmem:[%s3589_s21 + $0x94] ss:$24 sps:$4 sm:$0xff]   ;;  %v3083_v50 = vld [vmem:[%s3589_s21 + $0x90] ss:$24 sps:$4 sm:$0xff]   ;;  %v3089_v53 = vld [vmem:[%s3589_s21 + $0xc4] ss:$24 sps:$4 sm:$0xff]  }
  0x22   : > { %v3081_v45 = vld [vmem:[%s3589_s21 + $0x214] ss:$24 sps:$4 sm:$0xff]   ;;  %v3084_v51 = vld [vmem:[%s3589_s21 + $0x210] ss:$24 sps:$4 sm:$0xff]   ;;  %v3091_v54 = vld [vmem:[%s3589_s21 + $0x244] ss:$24 sps:$4 sm:$0xff]  }
  0x23   : > { %v3093_v59 = vld [vmem:[%s3589_s21 + $0xc0] ss:$24 sps:$4 sm:$0xff]   ;;  %v3099_v62 = vld [vmem:[%s3589_s21 + $0xf4] ss:$24 sps:$4 sm:$0xff]   ;;  %v3103_v6 = vld [vmem:[%s3589_s21 + $0xf0] ss:$24 sps:$4 sm:$0xff]  }
  0x24   : > { %2569 = vmatpush3.bf16.msra.mxu0 %v3044_v13  ;;  %2907 = vmatpush3.bf16.msra.mxu1 %v3044_v13  ;;  %v3094_v60 = vld [vmem:[%s3589_s21 + $0x240] ss:$24 sps:$4 sm:$0xff]   ;;  %v3118_v0 = vld [vmem:[%s4125_s1 + $0x130] sm:$0xff]   ;;  %v3109_v8 = vld [vmem:[%s3589_s21 + $0x124] ss:$24 sps:$4 sm:$0xff]  }
  0x25   : > { %2570 = vmatprep.subr.bf16.mxu0 %v3045_v14  ;;  %2900 = vmatprep.subr.bf16.mxu1 %v3045_v14  ;;  %v3101_v1 = vld [vmem:[%s3589_s21 + $0x274] ss:$24 sps:$4 sm:$0xff]   ;;  %v3126_v3 = vld [vmem:[%s4125_s1 + $0xb8] sm:$0xff]   ;;  %v3104_v7 = vld [vmem:[%s3589_s21 + $0x270] ss:$24 sps:$4 sm:$0xff]  }
  0x26   : > { %v3127_v4 = vld [vmem:[%s4125_s1 + $0x178] sm:$0xff]   ;;  %v3119_v12 = vld [vmem:[%s3589_s21 + $0x154] ss:$24 sps:$4 sm:$0xff]   ;;  %v3123_v14 = vld [vmem:[%s3589_s21 + $0x150] ss:$24 sps:$4 sm:$0xff]  }
  0x27   : > { %v3128_v5 = vld [vmem:[%s4125_s1 + $0x138] sm:$0xff]   ;;  %v3121_v13 = vld [vmem:[%s3589_s21 + $0x2d4] ss:$24 sps:$4 sm:$0xff]  }
  0x28   : > { %2571 = vmatpush3.bf16.msra.mxu0 %v3046_v15  ;;  %2908 = vmatpush3.bf16.msra.mxu1 %v3046_v15  ;;  %v3111_v9 = vld [vmem:[%s3589_s21 + $0x2a4] ss:$24 sps:$4 sm:$0xff]   ;;  %v3113_v10 = vld [vmem:[%s3589_s21 + $0x120] ss:$24 sps:$4 sm:$0xff]   ;;  %v3124_v15 = vld [vmem:[%s3589_s21 + $0x2d0] ss:$24 sps:$4 sm:$0xff]  }
  0x29   : > { %2572 = vmatprep.subr.bf16.mxu0 %v3047_v16  ;;  %2901 = vmatprep.subr.bf16.mxu1 %v3047_v16  ;;  %v3114_v11 = vld [vmem:[%s3589_s21 + $0x2a0] ss:$24 sps:$4 sm:$0xff]   ;;  %v3131_v16 = vld [vmem:[%s3589_s21 + $0xc] ss:$24 sps:$4 sm:$0xff]  }
  0x2c   : > { %2573 = vmatpush3.bf16.msra.mxu0 %v3048_v17  ;;  %2909 = vmatpush3.bf16.msra.mxu1 %v3048_v17  ;;  %v3134_v17 = vld [vmem:[%s3589_s21 + $0x14] ss:$24 sps:$4 sm:$0xff]  }
  0x2d   : > { %2670 = vmatprep.subr.bf16.mxu1 %v3055_v18  ;;  %2782 = vmatprep.subr.bf16.mxu0 %v3057_v20  ;;  %v3129_v18 = vld [vmem:[%s3589_s21 + $0x8] ss:$24 sps:$4 sm:$0xff]   ;;  %v3135_v20 = vld [vmem:[%s3589_s21 + $0x3c] ss:$24 sps:$4 sm:$0xff]  }
  0x2f   : > { %1243 = vmatmul.mubr.bf16.vlgmr.msra.gmra.mrb[0].mxu0 %v3049_v19  ;;  %1307 = vmatmul.mubr.bf16.vlgmr.msra.gmra.mrb[0].mxu1 %v3052_v21  ;;  %v3132_v19 = vld [vmem:[%s3589_s21 + $0x10] ss:$24 sps:$4 sm:$0xff]   ;;  %v3137_v21 = vld [vmem:[%s3589_s21 + $0x44] ss:$24 sps:$4 sm:$0xff]  }
  0x30   : > { %2671 = vmatpush3.bf16.msra.mxu1 %v3056_v22  ;;  %2783 = vmatpush3.bf16.msra.mxu0 %v3058_v23  ;;  %v3139_v22 = vld [vmem:[%s3589_s21 + $0x38] ss:$24 sps:$4 sm:$0xff]  }
  0x31   : > { %1250 = vmatprep.mubr.bf16.mxu0 %v3059_v24  ;;  %1314 = vmatprep.mubr.bf16.mxu1 %v3061_v25  ;;  %v3140_v23 = vld [vmem:[%s3589_s21 + $0x40] ss:$24 sps:$4 sm:$0xff]   ;;  %v3141_v24 = vld [vmem:[%s3589_s21 + $0x6c] ss:$24 sps:$4 sm:$0xff]  }
  0x32   : > { %2672 = vmatprep.subr.bf16.mxu1 %v3065_v26  ;;  %2784 = vmatprep.subr.bf16.mxu0 %v3067_v28  ;;  %v3143_v25 = vld [vmem:[%s3589_s21 + $0x74] ss:$24 sps:$4 sm:$0xff]   ;;  %v3145_v26 = vld [vmem:[%s3589_s21 + $0x68] ss:$24 sps:$4 sm:$0xff]  }
  0x33   : > { %v3147_v28 = vld [vmem:[%s3589_s21 + $0x9c] ss:$24 sps:$4 sm:$0xff]  }
  0x34   : > { %2673 = vmatpush3.bf16.msra.mxu1 %v3066_v27  ;;  %2785 = vmatpush3.bf16.msra.mxu0 %v3068_v29  ;;  %v3146_v27 = vld [vmem:[%s3589_s21 + $0x70] ss:$24 sps:$4 sm:$0xff]   ;;  %v3149_v29 = vld [vmem:[%s3589_s21 + $0xa4] ss:$24 sps:$4 sm:$0xff]  }
  0x35   : > { %2674 = vmatprep.subr.bf16.mxu1 %v3075_v30  ;;  %2786 = vmatprep.subr.bf16.mxu0 %v3077_v33  ;;  %v3151_v30 = vld [vmem:[%s3589_s21 + $0x98] ss:$24 sps:$4 sm:$0xff]   ;;  %v3155_v33 = vld [vmem:[%s3589_s21 + $0xd4] ss:$24 sps:$4 sm:$0xff]  }
  0x37   : > { %1251 = vmatmul.mubr.bf16.gmra.mrb[4].mxu0 %v3063_v31  ;;  %1315 = vmatmul.mubr.bf16.gmra.mrb[4].mxu1 %v3064_v32  ;;  %v3152_v31 = vld [vmem:[%s3589_s21 + $0xa0] ss:$24 sps:$4 sm:$0xff]   ;;  %v3153_v32 = vld [vmem:[%s3589_s21 + $0xcc] ss:$24 sps:$4 sm:$0xff]  }
  0x38   : > { %1258 = vmatprep.mubr.bf16.mxu0 %v3069_v34  ;;  %1322 = vmatprep.mubr.bf16.mxu1 %v3071_v35  ;;  %v3157_v34 = vld [vmem:[%s3589_s21 + $0xc8] ss:$24 sps:$4 sm:$0xff]  }
  0x39   : > { %2675 = vmatpush3.bf16.msra.mxu1 %v3076_v36  ;;  %2787 = vmatpush3.bf16.msra.mxu0 %v3078_v37  ;;  %v3158_v35 = vld [vmem:[%s3589_s21 + $0xd0] ss:$24 sps:$4 sm:$0xff]   ;;  %v3159_v36 = vld [vmem:[%s3589_s21 + $0xfc] ss:$24 sps:$4 sm:$0xff]  }
  0x3a   : > { %2676 = vmatprep.subr.bf16.mxu1 %v3085_v38  ;;  %2788 = vmatprep.subr.bf16.mxu0 %v3087_v39  ;;  %v3161_v37 = vld [vmem:[%s3589_s21 + $0x104] ss:$24 sps:$4 sm:$0xff]   ;;  %v3163_v38 = vld [vmem:[%s3589_s21 + $0xf8] ss:$24 sps:$4 sm:$0xff]  }
  0x3b   : > { %v3164_v39 = vld [vmem:[%s3589_s21 + $0x100] ss:$24 sps:$4 sm:$0xff]  }
  0x3d   : > { %2677 = vmatpush3.bf16.msra.mxu1 %v3086_v42  ;;  %2789 = vmatpush3.bf16.msra.mxu0 %v3088_v43  ;;  %v3169_v42 = vld [vmem:[%s3589_s21 + $0x128] ss:$24 sps:$4 sm:$0xff]  }
  0x3e   : > { %2678 = vmatprep.subr.bf16.mxu1 %v3095_v46  ;;  %2790 = vmatprep.subr.bf16.mxu0 %v3097_v48  ;;  %v3170_v43 = vld [vmem:[%s3589_s21 + $0x130] ss:$24 sps:$4 sm:$0xff]   ;;  %v3177_v48 = vld [vmem:[%s3589_s21 + $0x18c] ss:$24 sps:$4 sm:$0xff]  }
  0x3f   : > { %1259 = vmatmul.mubr.bf16.gmra.mrb[8].mxu0 %v3073_v40  ;;  %1323 = vmatmul.mubr.bf16.gmra.mrb[8].mxu1 %v3074_v41  ;;  %v3165_v40 = vld [vmem:[%s3589_s21 + $0x12c] ss:$24 sps:$4 sm:$0xff]   ;;  %v3175_v46 = vld [vmem:[%s3589_s21 + $0x158] ss:$24 sps:$4 sm:$0xff]  }
  0x40   : > { %1266 = vmatprep.mubr.bf16.mxu0 %v3079_v44  ;;  %1330 = vmatprep.mubr.bf16.mxu1 %v3081_v45  ;;  %v3167_v41 = vld [vmem:[%s3589_s21 + $0x134] ss:$24 sps:$4 sm:$0xff]   ;;  %v3173_v45 = vld [vmem:[%s3589_s21 + $0x164] ss:$24 sps:$4 sm:$0xff]  }
  0x41   : > { %2679 = vmatpush3.bf16.msra.mxu1 %v3096_v47  ;;  %2791 = vmatpush3.bf16.msra.mxu0 %v3098_v49  ;;  %v3171_v44 = vld [vmem:[%s3589_s21 + $0x15c] ss:$24 sps:$4 sm:$0xff]   ;;  %v3176_v47 = vld [vmem:[%s3589_s21 + $0x160] ss:$24 sps:$4 sm:$0xff]  }
  0x42   : > { %2680 = vmatprep.subr.bf16.mxu1 %v3105_v52  ;;  %2792 = vmatprep.subr.bf16.mxu0 %v3107_v56  ;;  %v3179_v49 = vld [vmem:[%s3589_s21 + $0x194] ss:$24 sps:$4 sm:$0xff]  }
  0x43   : > { %v3183_v52 = vld [vmem:[%s3589_s21 + $0x1bc] ss:$24 sps:$4 sm:$0xff]   ;;  %v3189_v56 = vld [vmem:[%s3589_s21 + $0x1ec] ss:$24 sps:$4 sm:$0xff]  }
  0x45   : > { %2681 = vmatpush3.bf16.msra.mxu1 %v3106_v55  ;;  %2793 = vmatpush3.bf16.msra.mxu0 %v3108_v57  ;;  %v3188_v55 = vld [vmem:[%s3589_s21 + $0x1c0] ss:$24 sps:$4 sm:$0xff]   ;;  %v3191_v57 = vld [vmem:[%s3589_s21 + $0x1f4] ss:$24 sps:$4 sm:$0xff]  }
  0x46   : > { %2682 = vmatprep.subr.bf16.mxu1 %v3115_v58  ;;  %2794 = vmatprep.subr.bf16.mxu0 %v3117_v63  ;;  %v3193_v58 = vld [vmem:[%s3589_s21 + $0x1e8] ss:$24 sps:$4 sm:$0xff]  }
  0x47   : > { %1267 = vmatmul.mubr.bf16.gmra.mrb[12].mxu0 %v3083_v50  ;;  %1331 = vmatmul.mubr.bf16.gmra.mrb[12].mxu1 %v3084_v51  ;;  %v3181_v50 = vld [vmem:[%s3589_s21 + $0x188] ss:$24 sps:$4 sm:$0xff]  }
  0x48   : > { %1274 = vmatprep.mubr.bf16.mxu0 %v3089_v53  ;;  %1338 = vmatprep.mubr.bf16.mxu1 %v3091_v54  ;;  %v3182_v51 = vld [vmem:[%s3589_s21 + $0x190] ss:$24 sps:$4 sm:$0xff]   ;;  %v3185_v53 = vld [vmem:[%s3589_s21 + $0x1c4] ss:$24 sps:$4 sm:$0xff]   ;;  %v3200_v63 = vld [vmem:[%s3589_s21 + $0x220] ss:$24 sps:$4 sm:$0xff]  }
  0x49   : > { %2683 = vmatpush3.bf16.msra.mxu1 %v3116_v61  ;;  %2795 = vmatpush3.bf16.msra.mxu0 %v3118_v0  ;;  %v3187_v54 = vld [vmem:[%s3589_s21 + $0x1b8] ss:$24 sps:$4 sm:$0xff]   ;;  %v3197_v61 = vld [vmem:[%s3589_s21 + $0x224] ss:$24 sps:$4 sm:$0xff]  }
  0x4a   : > { %2684 = vmatprep.subr.bf16.mxu1 %v3125_v2  ;;  %2796 = vmatprep.subr.bf16.mxu0 %v3127_v4  ;;  %v3201_v0 = vld [vmem:[%s3589_s21 + $0x24c] ss:$24 sps:$4 sm:$0xff]   ;;  %v3205_v2 = vld [vmem:[%s3589_s21 + $0x248] ss:$24 sps:$4 sm:$0xff]   ;;  %v3207_v4 = vld [vmem:[%s3589_s21 + $0x27c] ss:$24 sps:$4 sm:$0xff]  }
  0x4d   : > { %2685 = vmatpush3.bf16.msra.mxu1 %v3126_v3  ;;  %2797 = vmatpush3.bf16.msra.mxu0 %v3128_v5  ;;  %v3206_v3 = vld [vmem:[%s3589_s21 + $0x250] ss:$24 sps:$4 sm:$0xff]   ;;  %v3209_v5 = vld [vmem:[%s3589_s21 + $0x284] ss:$24 sps:$4 sm:$0xff]  }
  0x4f   : > { %1275 = vmatmul.mubr.bf16.gmra.mrb[16].mxu0 %v3093_v59  ;;  %1339 = vmatmul.mubr.bf16.gmra.mrb[16].mxu1 %v3094_v60  ;;  %v3194_v59 = vld [vmem:[%s3589_s21 + $0x1f0] ss:$24 sps:$4 sm:$0xff]   ;;  %v3195_v60 = vld [vmem:[%s3589_s21 + $0x21c] ss:$24 sps:$4 sm:$0xff]  }
  0x50   : > { %1282 = vmatprep.mubr.bf16.mxu0 %v3099_v62  ;;  %1346 = vmatprep.mubr.bf16.mxu1 %v3101_v1  ;;  %v3199_v62 = vld [vmem:[%s3589_s21 + $0x218] ss:$24 sps:$4 sm:$0xff]   ;;  %v3203_v1 = vld [vmem:[%s3589_s21 + $0x254] ss:$24 sps:$4 sm:$0xff]  }
  0x57   : > { %1283 = vmatmul.mubr.bf16.gmra.mrb[20].mxu0 %v3103_v6  ;;  %1347 = vmatmul.mubr.bf16.gmra.mrb[20].mxu1 %v3104_v7  ;;  %v3211_v6 = vld [vmem:[%s3589_s21 + $0x278] ss:$24 sps:$4 sm:$0xff]  }
  0x58   : > { %1290 = vmatprep.mubr.bf16.mxu0 %v3109_v8  ;;  %1354 = vmatprep.mubr.bf16.mxu1 %v3111_v9  ;;  %v3212_v7 = vld [vmem:[%s3589_s21 + $0x280] ss:$24 sps:$4 sm:$0xff]   ;;  %v3213_v8 = vld [vmem:[%s3589_s21 + $0x2ac] ss:$24 sps:$4 sm:$0xff]  }
  0x59   : > { %v3215_v9 = vld [vmem:[%s3589_s21 + $0x2b4] ss:$24 sps:$4 sm:$0xff]  }
  0x5f   : > { %1291 = vmatmul.mubr.bf16.gmra.mrb[24].mxu0 %v3113_v10  ;;  %1355 = vmatmul.mubr.bf16.gmra.mrb[24].mxu1 %v3114_v11  ;;  %v3217_v10 = vld [vmem:[%s3589_s21 + $0x2a8] ss:$24 sps:$4 sm:$0xff]  }
  0x60   : > { %1298 = vmatprep.mubr.bf16.mxu0 %v3119_v12  ;;  %1362 = vmatprep.mubr.bf16.mxu1 %v3121_v13  ;;  %v3218_v11 = vld [vmem:[%s3589_s21 + $0x2b0] ss:$24 sps:$4 sm:$0xff]   ;;  %v3219_v12 = vld [vmem:[%s3589_s21 + $0x2dc] ss:$24 sps:$4 sm:$0xff]  }
  0x61   : > { %v3221_v13 = vld [vmem:[%s3589_s21 + $0x2e4] ss:$24 sps:$4 sm:$0xff]  }
  0x67   : > { %1299 = vmatmul.mubr.bf16.gmra.mrb[28].mxu0 %v3123_v14  ;;  %1363 = vmatmul.mubr.bf16.gmra.mrb[28].mxu1 %v3124_v15  ;;  %v3223_v14 = vld [vmem:[%s3589_s21 + $0x2d8] ss:$24 sps:$4 sm:$0xff]  }
  0x68   : > { %1403 = vmatprep.mubr.bf16.mxu1 %v3131_v16  ;;  %1564 = vmatprep.mubr.bf16.mxu0 %v3134_v17  ;;  %v3224_v15 = vld [vmem:[%s3589_s21 + $0x2e0] ss:$24 sps:$4 sm:$0xff]   ;;  %s2359_s21 = sshll.u32 %s210_s10, 8 }
  0x69   : > { %s3911_s12 = scalar_lea.vmem [#allocation2], %s2359_s21  }
  0x6f   : > { %1404 = vmatmul.mubr.bf16.vlgmr.msra.gmra.mrb[32].mxu1 %v3129_v18  ;;  %1565 = vmatmul.mubr.bf16.vlgmr.msra.gmra.mrb[32].mxu0 %v3132_v19  ;;  %v3808_v18 = vld [vmem:[%s236_s8] ss:$0 sm:$0xff] }
  0x70   : > { %1411 = vmatprep.mubr.bf16.mxu1 %v3135_v20  ;;  %1572 = vmatprep.mubr.bf16.mxu0 %v3137_v21 }
  0x77   : > { %1412 = vmatmul.mubr.bf16.gmra.mrb[36].mxu1 %v3139_v22  ;;  %1573 = vmatmul.mubr.bf16.gmra.mrb[36].mxu0 %v3140_v23 }
  0x78   : > { %1419 = vmatprep.mubr.bf16.mxu1 %v3141_v24  ;;  %1580 = vmatprep.mubr.bf16.mxu0 %v3143_v25 }
  0x7f   : > { %1420 = vmatmul.mubr.bf16.gmra.mrb[40].mxu1 %v3145_v26  ;;  %1581 = vmatmul.mubr.bf16.gmra.mrb[40].mxu0 %v3146_v27 }
  0x80   : > { %1427 = vmatprep.mubr.bf16.mxu1 %v3147_v28  ;;  %1588 = vmatprep.mubr.bf16.mxu0 %v3149_v29 }
  0x87   : > { %1428 = vmatmul.mubr.bf16.gmra.mrb[44].mxu1 %v3151_v30  ;;  %1589 = vmatmul.mubr.bf16.gmra.mrb[44].mxu0 %v3152_v31 }
  0x88   : > { %1435 = vmatprep.mubr.bf16.mxu1 %v3153_v32  ;;  %1596 = vmatprep.mubr.bf16.mxu0 %v3155_v33 }
  0x8f   : > { %1436 = vmatmul.mubr.bf16.gmra.mrb[48].mxu1 %v3157_v34  ;;  %1597 = vmatmul.mubr.bf16.gmra.mrb[48].mxu0 %v3158_v35 }
  0x90   : > { %1443 = vmatprep.mubr.bf16.mxu1 %v3159_v36  ;;  %1604 = vmatprep.mubr.bf16.mxu0 %v3161_v37 }
  0x97   : > { %1444 = vmatmul.mubr.bf16.gmra.mrb[52].mxu1 %v3163_v38  ;;  %1605 = vmatmul.mubr.bf16.gmra.mrb[52].mxu0 %v3164_v39 }
  0x98   : > { %1451 = vmatprep.mubr.bf16.mxu1 %v3165_v40  ;;  %1612 = vmatprep.mubr.bf16.mxu0 %v3167_v41 }
  0x9f   : > { %1452 = vmatmul.mubr.bf16.gmra.mrb[56].mxu1 %v3169_v42  ;;  %1613 = vmatmul.mubr.bf16.gmra.mrb[56].mxu0 %v3170_v43 }
  0xa0   : > { %1459 = vmatprep.mubr.bf16.mxu1 %v3171_v44  ;;  %1620 = vmatprep.mubr.bf16.mxu0 %v3173_v45 }
  0xa7   : > { %1460 = vmatmul.mubr.bf16.gmra.mrb[60].mxu1 %v3175_v46  ;;  %1621 = vmatmul.mubr.bf16.gmra.mrb[60].mxu0 %v3176_v47 }
  0xa8   : > { %1467 = vmatprep.mubr.bf16.mxu1 %v3177_v48  ;;  %1628 = vmatprep.mubr.bf16.mxu0 %v3179_v49 }
  0xaf   : > { %1468 = vmatmul.mubr.bf16.gmra.mrb[64].mxu1 %v3181_v50  ;;  %1629 = vmatmul.mubr.bf16.gmra.mrb[64].mxu0 %v3182_v51 }
  0xb0   : > { %1475 = vmatprep.mubr.bf16.mxu1 %v3183_v52  ;;  %1636 = vmatprep.mubr.bf16.mxu0 %v3185_v53 }
  0xb7   : > { %1476 = vmatmul.mubr.bf16.gmra.mrb[68].mxu1 %v3187_v54  ;;  %1637 = vmatmul.mubr.bf16.gmra.mrb[68].mxu0 %v3188_v55 }
  0xb8   : > { %1483 = vmatprep.mubr.bf16.mxu1 %v3189_v56  ;;  %1644 = vmatprep.mubr.bf16.mxu0 %v3191_v57 }
  0xbf   : > { %1484 = vmatmul.mubr.bf16.gmra.mrb[72].mxu1 %v3193_v58  ;;  %1645 = vmatmul.mubr.bf16.gmra.mrb[72].mxu0 %v3194_v59 }
  0xc0   : > { %1491 = vmatprep.mubr.bf16.mxu1 %v3195_v60  ;;  %1652 = vmatprep.mubr.bf16.mxu0 %v3197_v61 }
  0xc7   : > { %1492 = vmatmul.mubr.bf16.gmra.mrb[76].mxu1 %v3199_v62  ;;  %1653 = vmatmul.mubr.bf16.gmra.mrb[76].mxu0 %v3200_v63 }
  0xc8   : > { %1499 = vmatprep.mubr.bf16.mxu1 %v3201_v0  ;;  %1660 = vmatprep.mubr.bf16.mxu0 %v3203_v1 }
  0xcf   : > { %1500 = vmatmul.mubr.bf16.gmra.mrb[80].mxu1 %v3205_v2  ;;  %1661 = vmatmul.mubr.bf16.gmra.mrb[80].mxu0 %v3206_v3 }
  0xd0   : > { %1507 = vmatprep.mubr.bf16.mxu1 %v3207_v4  ;;  %1668 = vmatprep.mubr.bf16.mxu0 %v3209_v5 }
  0xd7   : > { %1508 = vmatmul.mubr.bf16.gmra.mrb[84].mxu1 %v3211_v6  ;;  %1669 = vmatmul.mubr.bf16.gmra.mrb[84].mxu0 %v3212_v7 }
  0xd8   : > { %1515 = vmatprep.mubr.bf16.mxu1 %v3213_v8  ;;  %1676 = vmatprep.mubr.bf16.mxu0 %v3215_v9 }
  0xdf   : > { %1516 = vmatmul.mubr.bf16.gmra.mrb[88].mxu1 %v3217_v10  ;;  %1677 = vmatmul.mubr.bf16.gmra.mrb[88].mxu0 %v3218_v11 }
  0xe0   : > { %1523 = vmatprep.mubr.bf16.mxu1 %v3219_v12  ;;  %1684 = vmatprep.mubr.bf16.mxu0 %v3221_v13 }
  0xe7   : > { %1524 = vmatmul.mubr.bf16.gmra.mrb[92].mxu1 %v3223_v14  ;;  %1685 = vmatmul.mubr.bf16.gmra.mrb[92].mxu0 %v3224_v15 }
 0x102   : > { %v2574_v16 = vpop.f32.mrb[0].mxu0  ;;  %v2622_v17 = vpop.f32.mrb[0].mxu1 }
 0x103   : > { %v2575_v19 = vpop.f32.mrb[1].mxu0  ;;  %v2623_v20 = vpop.f32.mrb[1].mxu1 }
 0x104   : > { %v3810_v21 = vadd.f32 %v2575_v19, %v2574_v16  ;;  %v2624_v22 = vadd.f32 %v2623_v20, %v2622_v17  ;;  %v2577_v23 = vpop.f32.mrb[2].mxu0  ;;  %v2625_v24 = vpop.f32.mrb[2].mxu1 }
 0x105   : > { %v2578_v25 = vpop.f32.mrb[3].mxu0  ;;  %v2626_v26 = vpop.f32.mrb[3].mxu1 }
 0x106   : > { %v3813_v27 = vadd.f32 %v2624_v22, %v3808_v18  ;;  %v3815_v28 = vadd.f32 %v2578_v25, %v2577_v23  ;;  %v2627_v29 = vadd.f32 %v2626_v26, %v2625_v24 }
 0x108   : > { %v3818_v30 = vadd.f32 %v2627_v29, %v3808_v18 }
 0x10a   : > { %v2580_v31 = vpop.f32.mrb[4].mxu0  ;;  %v2628_v32 = vpop.f32.mrb[4].mxu1 }
 0x10b   : > { %v2581_v33 = vpop.f32.mrb[5].mxu0  ;;  %v2629_v34 = vpop.f32.mrb[5].mxu1 }
 0x10c   : > { %v3820_v35 = vadd.f32 %v2581_v33, %v2580_v31  ;;  %v2630_v36 = vadd.f32 %v2629_v34, %v2628_v32  ;;  %v2583_v37 = vpop.f32.mrb[6].mxu0  ;;  %v2631_v38 = vpop.f32.mrb[6].mxu1 }
 0x10d   : > { %v2584_v39 = vpop.f32.mrb[7].mxu0  ;;  %v2632_v40 = vpop.f32.mrb[7].mxu1 }
 0x10e   : > { %v3823_v41 = vadd.f32 %v2630_v36, %v3808_v18  ;;  %v3825_v42 = vadd.f32 %v2584_v39, %v2583_v37  ;;  %v2633_v43 = vadd.f32 %v2632_v40, %v2631_v38 }
 0x110   : > { %v3828_v44 = vadd.f32 %v2633_v43, %v3808_v18 }
 0x112   : > { %v2586_v45 = vpop.f32.mrb[8].mxu0  ;;  %v2634_v46 = vpop.f32.mrb[8].mxu1 }
 0x113   : > { %v2587_v47 = vpop.f32.mrb[9].mxu0  ;;  %v2635_v48 = vpop.f32.mrb[9].mxu1 }
 0x114   : > { %v3830_v49 = vadd.f32 %v2587_v47, %v2586_v45  ;;  %v2636_v50 = vadd.f32 %v2635_v48, %v2634_v46  ;;  %v2589_v51 = vpop.f32.mrb[10].mxu0  ;;  %v2637_v52 = vpop.f32.mrb[10].mxu1 }
 0x115   : > { %v2590_v53 = vpop.f32.mrb[11].mxu0  ;;  %v2638_v54 = vpop.f32.mrb[11].mxu1 }
 0x116   : > { %v3833_v55 = vadd.f32 %v2636_v50, %v3808_v18  ;;  %v3835_v56 = vadd.f32 %v2590_v53, %v2589_v51  ;;  %v2639_v57 = vadd.f32 %v2638_v54, %v2637_v52 }
 0x118   : > { %v3838_v58 = vadd.f32 %v2639_v57, %v3808_v18 }
 0x11a   : > { %v2592_v59 = vpop.f32.mrb[12].mxu0  ;;  %v2640_v60 = vpop.f32.mrb[12].mxu1 }
 0x11b   : > { %v2593_v61 = vpop.f32.mrb[13].mxu0  ;;  %v2641_v62 = vpop.f32.mrb[13].mxu1 }
 0x11c   : > { %v3840_v63 = vadd.f32 %v2593_v61, %v2592_v59  ;;  %v2642_v0 = vadd.f32 %v2641_v62, %v2640_v60  ;;  %v2595_v1 = vpop.f32.mrb[14].mxu0  ;;  %v2643_v2 = vpop.f32.mrb[14].mxu1 }
 0x11d   : > { %v2596_v3 = vpop.f32.mrb[15].mxu0  ;;  %v2644_v4 = vpop.f32.mrb[15].mxu1 }
 0x11e   : > { %v3843_v5 = vadd.f32 %v2642_v0, %v3808_v18  ;;  %v3845_v6 = vadd.f32 %v2596_v3, %v2595_v1  ;;  %v2645_v7 = vadd.f32 %v2644_v4, %v2643_v2 }
 0x120   : > { %v3848_v8 = vadd.f32 %v2645_v7, %v3808_v18 }
 0x122   : > { %v2598_v9 = vpop.f32.mrb[16].mxu0  ;;  %v2646_v10 = vpop.f32.mrb[16].mxu1 }
 0x123   : > { %v2599_v11 = vpop.f32.mrb[17].mxu0  ;;  %v2647_v12 = vpop.f32.mrb[17].mxu1 }
 0x124   : > { %v3850_v13 = vadd.f32 %v2599_v11, %v2598_v9  ;;  %v2648_v14 = vadd.f32 %v2647_v12, %v2646_v10  ;;  %v2601_v15 = vpop.f32.mrb[18].mxu0  ;;  %v2649_v16 = vpop.f32.mrb[18].mxu1 }
 0x125   : > { %v2602_v17 = vpop.f32.mrb[19].mxu0  ;;  %v2650_v19 = vpop.f32.mrb[19].mxu1 }
 0x126   : > { %v3853_v20 = vadd.f32 %v2648_v14, %v3808_v18  ;;  %v3855_v22 = vadd.f32 %v2602_v17, %v2601_v15  ;;  %v2651_v23 = vadd.f32 %v2650_v19, %v2649_v16 }
 0x128   : > { %v3858_v24 = vadd.f32 %v2651_v23, %v3808_v18 }
 0x12a   : > { %v2604_v25 = vpop.f32.mrb[20].mxu0  ;;  %v2652_v26 = vpop.f32.mrb[20].mxu1 }
 0x12b   : > { %v2605_v29 = vpop.f32.mrb[21].mxu0  ;;  %v2653_v31 = vpop.f32.mrb[21].mxu1 }
 0x12c   : > { %v3860_v32 = vadd.f32 %v2605_v29, %v2604_v25  ;;  %v2654_v33 = vadd.f32 %v2653_v31, %v2652_v26  ;;  %v2607_v34 = vpop.f32.mrb[22].mxu0  ;;  %v2655_v36 = vpop.f32.mrb[22].mxu1  ;;  %v1245_v31 = vadd.f32 %v3810_v21, %v3808_v18  ;;  %v1253_v21 = vadd.f32 %v3820_v35, %v3808_v18 }
 0x12d   : > { %v2608_v37 = vpop.f32.mrb[23].mxu0  ;;  %v2656_v38 = vpop.f32.mrb[23].mxu1 }
 0x12e   : > { %v3863_v39 = vadd.f32 %v2654_v33, %v3808_v18  ;;  %v3865_v40 = vadd.f32 %v2608_v37, %v2607_v34  ;;  %v2657_v43 = vadd.f32 %v2656_v38, %v2655_v36 }
 0x130   : > { %v3868_v45 = vadd.f32 %v2657_v43, %v3808_v18 }
 0x132   : > { %v2610_v46 = vpop.f32.mrb[24].mxu0  ;;  %v2658_v47 = vpop.f32.mrb[24].mxu1 }
 0x133   : > { %v2611_v48 = vpop.f32.mrb[25].mxu0  ;;  %v2659_v50 = vpop.f32.mrb[25].mxu1 }
 0x134   : > { %v3870_v51 = vadd.f32 %v2611_v48, %v2610_v46  ;;  %v2660_v52 = vadd.f32 %v2659_v50, %v2658_v47  ;;  %v2613_v53 = vpop.f32.mrb[26].mxu0  ;;  %v2661_v54 = vpop.f32.mrb[26].mxu1  ;;  %v1248_v46 = vadd.f32 %v3815_v28, %v3808_v18 }
 0x135   : > { %v2614_v57 = vpop.f32.mrb[27].mxu0  ;;  %v2662_v59 = vpop.f32.mrb[27].mxu1 }
 0x136   : > { %v3873_v60 = vadd.f32 %v2660_v52, %v3808_v18  ;;  %v3875_v61 = vadd.f32 %v2614_v57, %v2613_v53  ;;  %v2663_v62 = vadd.f32 %v2662_v59, %v2661_v54 }
 0x138   : > { %v3878_v0 = vadd.f32 %v2663_v62, %v3808_v18 }
 0x13a   : > { %v2616_v1 = vpop.f32.mrb[28].mxu0  ;;  %v2664_v2 = vpop.f32.mrb[28].mxu1 }
 0x13b   : > { %v2617_v3 = vpop.f32.mrb[29].mxu0  ;;  %v2665_v4 = vpop.f32.mrb[29].mxu1 }
 0x13c   : > { %v3880_v7 = vadd.f32 %v2617_v3, %v2616_v1  ;;  %v2666_v9 = vadd.f32 %v2665_v4, %v2664_v2  ;;  %v2619_v10 = vpop.f32.mrb[30].mxu0  ;;  %v2667_v11 = vpop.f32.mrb[30].mxu1 }
 0x13d   : > { %v2620_v12 = vpop.f32.mrb[31].mxu0  ;;  %v2668_v14 = vpop.f32.mrb[31].mxu1 }
 0x13e   : > { %v3883_v15 = vadd.f32 %v2666_v9, %v3808_v18  ;;  %v3885_v16 = vadd.f32 %v2620_v12, %v2619_v10  ;;  %v2669_v17 = vadd.f32 %v2668_v14, %v2667_v11  ;;  %v1256_v11 = vadd.f32 %v3825_v42, %v3808_v18 }
 0x140   : > { %v3888_v19 = vadd.f32 %v2669_v17, %v3808_v18 }
 0x142   : > { %v2686_v23 = vpop.f32.mrb[32].mxu1  ;;  %v2798_v25 = vpop.f32.mrb[32].mxu0 }
 0x143   : > { %v2687_v26 = vpop.f32.mrb[33].mxu1  ;;  %v2799_v29 = vpop.f32.mrb[33].mxu0 }
 0x144   : > { %v2688_v33 = vadd.f32 %v2687_v26, %v2686_v23  ;;  %v2800_v34 = vadd.f32 %v2799_v29, %v2798_v25  ;;  %v2689_v36 = vpop.f32.mrb[34].mxu1  ;;  %v2801_v37 = vpop.f32.mrb[34].mxu0 }
 0x145   : > { %v2690_v38 = vpop.f32.mrb[35].mxu1  ;;  %v2802_v43 = vpop.f32.mrb[35].mxu0 }
 0x146   : > { %v1406_v47 = vadd.f32 %v2688_v33, %v1245_v31  ;;  %v2691_v48 = vadd.f32 %v2690_v38, %v2689_v36  ;;  %v2803_v50 = vadd.f32 %v2802_v43, %v2801_v37  ;;  %v1261_v36 = vadd.f32 %v3830_v49, %v3808_v18 }
 0x148   : > { %v1567_v52 = vadd.f32 %v2800_v34, %v1406_v47  ;;  %v1409_v53 = vadd.f32 %v2691_v48, %v1248_v46 }
 0x14a   : > { %v2507_v54 = vmul.f32 -1.442695, %v1567_v52  ;;  %v1570_v57 = vadd.f32 %v2803_v50, %v1409_v53  ;;  %v2692_v59 = vpop.f32.mrb[36].mxu1  ;;  %v2804_v62 = vpop.f32.mrb[36].mxu0  ;;  %v1264_v50 = vadd.f32 %v3835_v56, %v3808_v18  ;;  %v1269_v56 = vadd.f32 %v3840_v63, %v3808_v18 }
 0x14b   : > { %v2693_v1 = vpop.f32.mrb[37].mxu1  ;;  %v2805_v2 = vpop.f32.mrb[37].mxu0 }
 0x14c   : > { %3225 = vpow2.f32 %v2507_v54  ;;  %v2508_v3 = vmul.f32 -1.442695, %v1570_v57  ;;  %v2694_v4 = vadd.f32 %v2693_v1, %v2692_v59  ;;  %v2806_v9 = vadd.f32 %v2805_v2, %v2804_v62  ;;  %v2695_v10 = vpop.f32.mrb[38].mxu1  ;;  %v2807_v28 = vpop.f32.mrb[38].mxu0 }
 0x14d   : > { %v2696_v12 = vpop.f32.mrb[39].mxu1  ;;  %v2808_v14 = vpop.f32.mrb[39].mxu0 }
 0x14e   : > { %3227 = vpow2.f32 %v2508_v3  ;;  %v1414_v17 = vadd.f32 %v2694_v4, %v1253_v21  ;;  %v2697_v23 = vadd.f32 %v2696_v12, %v2695_v10  ;;  %v2809_v25 = vadd.f32 %v2808_v14, %v2807_v28 }
 0x150   : > { %v1575_v26 = vadd.f32 %v2806_v9, %v1414_v17  ;;  %v1417_v29 = vadd.f32 %v2697_v23, %v1256_v11 }
 0x152   : > { %v2509_v35 = vmul.f32 -1.442695, %v1575_v26  ;;  %v1578_v31 = vadd.f32 %v2809_v25, %v1417_v29  ;;  %v2698_v33 = vpop.f32.mrb[40].mxu1  ;;  %v2810_v34 = vpop.f32.mrb[40].mxu0  ;;  %v1272_v29 = vadd.f32 %v3845_v6, %v3808_v18 }
 0x153   : > { %v2699_v37 = vpop.f32.mrb[41].mxu1  ;;  %v2811_v38 = vpop.f32.mrb[41].mxu0 }
 0x154   : > { %3229 = vpow2.f32 %v2509_v35  ;;  %v2510_v43 = vmul.f32 -1.442695, %v1578_v31  ;;  %v2700_v42 = vadd.f32 %v2699_v37, %v2698_v33  ;;  %v2812_v46 = vadd.f32 %v2811_v38, %v2810_v34  ;;  %v2701_v47 = vpop.f32.mrb[42].mxu1  ;;  %v2813_v48 = vpop.f32.mrb[42].mxu0 }
 0x155   : > { %v2702_v52 = vpop.f32.mrb[43].mxu1  ;;  %v2814_v53 = vpop.f32.mrb[43].mxu0 }
 0x156   : > { %v3226_v54 = vpop.eup %3225  ;;  %3231 = vpow2.f32 %v2510_v43  ;;  %v1422_v57 = vadd.f32 %v2700_v42, %v1261_v36  ;;  %v2703_v59 = vadd.f32 %v2702_v52, %v2701_v47  ;;  %v2815_v62 = vadd.f32 %v2814_v53, %v2813_v48 }
 0x157   : > { %v1789_v21 = vadd.f32 1.0, %v3226_v54  ;;  %v1277_v53 = vadd.f32 %v3850_v13, %v3808_v18  ;;  %v1280_v13 = vadd.f32 %v3855_v22, %v3808_v18  ;;  %v1285_v22 = vadd.f32 %v3860_v32, %v3808_v18 }
 0x158   : > { %v3228_v49 = vpop.eup %3227  ;;  %v1583_v1 = vadd.f32 %v2812_v46, %v1422_v57  ;;  %v1425_v2 = vadd.f32 %v2703_v59, %v1264_v50 }
 0x159   : > { %3233 = vrcp.f32 %v1789_v21  ;;  %v1790_v3 = vadd.f32 1.0, %v3228_v49 }
 0x15a   : > { %v2511_v4 = vmul.f32 -1.442695, %v1583_v1  ;;  %v1586_v9 = vadd.f32 %v2815_v62, %v1425_v2  ;;  %v2704_v10 = vpop.f32.mrb[44].mxu1  ;;  %v2816_v28 = vpop.f32.mrb[44].mxu0 }
 0x15b   : > { %3235 = vrcp.f32 %v1790_v3  ;;  %v2705_v11 = vpop.f32.mrb[45].mxu1  ;;  %v2817_v12 = vpop.f32.mrb[45].mxu0 }
 0x15c   : > { %3237 = vpow2.f32 %v2511_v4  ;;  %v2512_v14 = vmul.f32 -1.442695, %v1586_v9  ;;  %v2706_v17 = vadd.f32 %v2705_v11, %v2704_v10  ;;  %v2818_v23 = vadd.f32 %v2817_v12, %v2816_v28  ;;  %v2707_v25 = vpop.f32.mrb[46].mxu1  ;;  %v2819_v26 = vpop.f32.mrb[46].mxu0 }
 0x15d   : > { %v2708_v35 = vpop.f32.mrb[47].mxu1  ;;  %v2820_v31 = vpop.f32.mrb[47].mxu0 }
 0x15e   : > { %v3230_v33 = vpop.eup %3229  ;;  %3239 = vpow2.f32 %v2512_v14  ;;  %v1430_v34 = vadd.f32 %v2706_v17, %v1269_v56  ;;  %v2709_v36 = vadd.f32 %v2708_v35, %v2707_v25  ;;  %v2821_v63 = vadd.f32 %v2820_v31, %v2819_v26 }
 0x15f   : > { %v1791_v37 = vadd.f32 1.0, %v3230_v33 }
 0x160   : > { %v3232_v38 = vpop.eup %3231  ;;  %v1591_v43 = vadd.f32 %v2818_v23, %v1430_v34  ;;  %v1433_v42 = vadd.f32 %v2709_v36, %v1272_v29 }
 0x161   : > { %3241 = vrcp.f32 %v1791_v37  ;;  %v1792_v46 = vadd.f32 1.0, %v3232_v38 }
 0x162   : > { %v2513_v47 = vmul.f32 -1.442695, %v1591_v43  ;;  %v1594_v48 = vadd.f32 %v2821_v63, %v1433_v42  ;;  %v2710_v50 = vpop.f32.mrb[48].mxu1  ;;  %v2822_v52 = vpop.f32.mrb[48].mxu0 }
 0x163   : > { %v3234_v6 = vpop.eup %3233  ;;  %3243 = vrcp.f32 %v1792_v46  ;;  %v2711_v54 = vpop.f32.mrb[49].mxu1 }
 0x164   : > { %v2823_v57 = vpop.f32.mrb[49].mxu0  ;;  %v1885_v59 = vmul.f32 %v3234_v6, %v3234_v6  ;;  %3245 = vpow2.f32 %v2513_v47  ;;  %v2514_v62 = vmul.f32 -1.442695, %v1594_v48  ;;  %v2712_v21 = vadd.f32 %v2711_v54, %v2710_v50  ;;  %v2713_v49 = vpop.f32.mrb[50].mxu1 }
 0x165   : > { %v2825_v1 = vpop.f32.mrb[50].mxu0  ;;  %v3236_v2 = vpop.eup %3235  ;;  %v2824_v3 = vadd.f32 %v2823_v57, %v2822_v52  ;;  %v1288_v52 = vadd.f32 %v3865_v40, %v3808_v18 }
 0x166   : > { %v2714_v4 = vpop.f32.mrb[51].mxu1  ;;  %v2826_v9 = vpop.f32.mrb[51].mxu0  ;;  %v1917_v28 = vmul.f32 %v1885_v59, %v1885_v59  ;;  %v1886_v56 = vmul.f32 %v3236_v2, %v3236_v2  ;;  %3247 = vpow2.f32 %v2514_v62  ;;  %v1438_v11 = vadd.f32 %v2712_v21, %v1277_v53 }
 0x167   : > { %v3238_v10 = vpop.eup %3237  ;;  %v2715_v14 = vadd.f32 %v2714_v4, %v2713_v49  ;;  %v2827_v17 = vadd.f32 %v2826_v9, %v2825_v1 }
 0x168   : > { %v1793_v12 = vadd.f32 1.0, %v3238_v10  ;;  %v3240_v23 = vpop.eup %3239  ;;  %1949 = vst [vmem:[%s3911_s12] sm:$0xff] %v1917_v28  ;;  %v1918_v25 = vmul.f32 %v1886_v56, %v1886_v56  ;;  %v1599_v26 = vadd.f32 %v2824_v3, %v1438_v11 }
 0x169   : > { %v1794_v29 = vadd.f32 1.0, %v3240_v23  ;;  %v1441_v35 = vadd.f32 %v2715_v14, %v1280_v13 }
 0x16a   : > { %3249 = vrcp.f32 %v1793_v12  ;;  %1950 = vst [vmem:[%s3911_s12 + $0x8] sm:$0xff] %v1918_v25  ;;  %v2515_v31 = vmul.f32 -1.442695, %v1599_v26  ;;  %v2716_v33 = vpop.f32.mrb[52].mxu1  ;;  %v2828_v34 = vpop.f32.mrb[52].mxu0  ;;  %v1293_v12 = vadd.f32 %v3870_v51, %v3808_v18 }
 0x16b   : > { %v3242_v36 = vpop.eup %3241  ;;  %3251 = vrcp.f32 %v1794_v29  ;;  %v1602_v63 = vadd.f32 %v2827_v17, %v1441_v35  ;;  %v2717_v37 = vpop.f32.mrb[53].mxu1 }
 0x16c   : > { %v2829_v38 = vpop.f32.mrb[53].mxu0  ;;  %v1887_v43 = vmul.f32 %v3242_v36, %v3242_v36  ;;  %3253 = vpow2.f32 %v2515_v31  ;;  %v2718_v42 = vadd.f32 %v2717_v37, %v2716_v33  ;;  %v2719_v47 = vpop.f32.mrb[54].mxu1 }
 0x16d   : > { %v2830_v46 = vadd.f32 %v2829_v38, %v2828_v34  ;;  %v2831_v48 = vpop.f32.mrb[54].mxu0  ;;  %v3244_v50 = vpop.eup %3243  ;;  %v2516_v6 = vmul.f32 -1.442695, %v1602_v63  ;;  %v1296_v38 = vadd.f32 %v3875_v61, %v3808_v18 }
 0x16e   : > { %v2720_v53 = vpop.f32.mrb[55].mxu1  ;;  %v2832_v54 = vpop.f32.mrb[55].mxu0  ;;  %v1919_v57 = vmul.f32 %v1887_v43, %v1887_v43  ;;  %v1888_v59 = vmul.f32 %v3244_v50, %v3244_v50  ;;  %v1446_v62 = vadd.f32 %v2718_v42, %v1285_v22 }
 0x16f   : > { %v3246_v32 = vpop.eup %3245  ;;  %v2721_v21 = vadd.f32 %v2720_v53, %v2719_v47  ;;  %3255 = vpow2.f32 %v2516_v6  ;;  %v2833_v1 = vadd.f32 %v2832_v54, %v2831_v48 }
 0x170   : > { %v1795_v49 = vadd.f32 1.0, %v3246_v32  ;;  %v3248_v2 = vpop.eup %3247  ;;  %1951 = vst [vmem:[%s3911_s12 + $0x10] sm:$0xff] %v1919_v57  ;;  %v1920_v3 = vmul.f32 %v1888_v59, %v1888_v59  ;;  %v1607_v4 = vadd.f32 %v2830_v46, %v1446_v62  ;;  %v1301_v59 = vadd.f32 %v3880_v7, %v3808_v18 }
 0x171   : > { %v1449_v9 = vadd.f32 %v2721_v21, %v1288_v52  ;;  %v1796_v10 = vadd.f32 1.0, %v3248_v2 }
 0x172   : > { %3257 = vrcp.f32 %v1795_v49  ;;  %1952 = vst [vmem:[%s3911_s12 + $0x18] sm:$0xff] %v1920_v3  ;;  %v2517_v40 = vmul.f32 -1.442695, %v1607_v4  ;;  %v2722_v56 = vpop.f32.mrb[56].mxu1  ;;  %v2834_v11 = vpop.f32.mrb[56].mxu0 }
 0x173   : > { %v1610_v28 = vadd.f32 %v2833_v1, %v1449_v9  ;;  %3259 = vrcp.f32 %v1796_v10  ;;  %v2723_v14 = vpop.f32.mrb[57].mxu1  ;;  %v2835_v17 = vpop.f32.mrb[57].mxu0  ;;  %v1304_v10 = vadd.f32 %v3885_v16, %v3808_v18 }
 0x174   : > { %v3250_v13 = vpop.eup %3249  ;;  %3261 = vpow2.f32 %v2517_v40  ;;  %v2724_v26 = vadd.f32 %v2723_v14, %v2722_v56  ;;  %v2725_v29 = vpop.f32.mrb[58].mxu1  ;;  %v2836_v33 = vadd.f32 %v2835_v17, %v2834_v11 }
 0x175   : > { %v1889_v23 = vmul.f32 %v3250_v13, %v3250_v13  ;;  %v2518_v25 = vmul.f32 -1.442695, %v1610_v28  ;;  %v2837_v35 = vpop.f32.mrb[58].mxu0  ;;  %v3252_v31 = vpop.eup %3251 }
 0x176   : > { %v2726_v34 = vpop.f32.mrb[59].mxu1  ;;  %v2838_v36 = vpop.f32.mrb[59].mxu0  ;;  %v1890_v37 = vmul.f32 %v3252_v31, %v3252_v31  ;;  %v1454_v51 = vadd.f32 %v2724_v26, %v1293_v12 }
 0x177   : > { %v3254_v22 = vpop.eup %3253  ;;  %v1921_v63 = vmul.f32 %v1889_v23, %v1889_v23  ;;  %3263 = vpow2.f32 %v2518_v25  ;;  %v2727_v42 = vadd.f32 %v2726_v34, %v2725_v29  ;;  %v2839_v46 = vadd.f32 %v2838_v36, %v2837_v35 }
 0x178   : > { %v1797_v43 = vadd.f32 1.0, %v3254_v22  ;;  %v1922_v47 = vmul.f32 %v1890_v37, %v1890_v37  ;;  %v1615_v48 = vadd.f32 %v2836_v33, %v1454_v51 }
 0x179   : > { %1953 = vst [vmem:[%s3911_s12 + $0x20] sm:$0xff] %v1921_v63  ;;  %v3256_v50 = vpop.eup %3255  ;;  %v1457_v52 = vadd.f32 %v2727_v42, %v1296_v38 }
 0x17a   : > { %3265 = vrcp.f32 %v1797_v43  ;;  %1954 = vst [vmem:[%s3911_s12 + $0x28] sm:$0xff] %v1922_v47  ;;  %v1798_v6 = vadd.f32 1.0, %v3256_v50  ;;  %v2519_v53 = vmul.f32 -1.442695, %v1615_v48  ;;  %v2728_v54 = vpop.f32.mrb[60].mxu1  ;;  %v2840_v32 = vpop.f32.mrb[60].mxu0 }
 0x17b   : > { %v1618_v62 = vadd.f32 %v2839_v46, %v1457_v52  ;;  %v2729_v61 = vpop.f32.mrb[61].mxu1  ;;  %v2841_v21 = vpop.f32.mrb[61].mxu0 }
 0x17c   : > { %v3258_v57 = vpop.eup %3257  ;;  %3267 = vrcp.f32 %v1798_v6  ;;  %v2730_v1 = vadd.f32 %v2729_v61, %v2728_v54  ;;  %v2842_v2 = vadd.f32 %v2841_v21, %v2840_v32  ;;  %v2731_v3 = vpop.f32.mrb[62].mxu1 }
 0x17d   : > { %v1891_v49 = vmul.f32 %v3258_v57, %v3258_v57  ;;  %v2843_v4 = vpop.f32.mrb[62].mxu0  ;;  %v3260_v9 = vpop.eup %3259  ;;  %3269 = vpow2.f32 %v2519_v53  ;;  %v2520_v40 = vmul.f32 -1.442695, %v1618_v62 }
 0x17e   : > { %v2732_v28 = vpop.f32.mrb[63].mxu1  ;;  %v2844_v56 = vpop.f32.mrb[63].mxu0  ;;  %v1892_v13 = vmul.f32 %v3260_v9, %v3260_v9  ;;  %v1462_v12 = vadd.f32 %v2730_v1, %v1301_v59 }
 0x17f   : > { %v3262_v7 = vpop.eup %3261  ;;  %v1923_v11 = vmul.f32 %v1891_v49, %v1891_v49  ;;  %v2733_v14 = vadd.f32 %v2732_v28, %v2731_v3  ;;  %3271 = vpow2.f32 %v2520_v40  ;;  %v2845_v23 = vadd.f32 %v2844_v56, %v2843_v4 }
 0x180   : > { %v1799_v17 = vadd.f32 1.0, %v3262_v7  ;;  %v1924_v26 = vmul.f32 %v1892_v13, %v1892_v13  ;;  %v1623_v29 = vadd.f32 %v2842_v2, %v1462_v12 }
 0x181   : > { %v3264_v25 = vpop.eup %3263  ;;  %1955 = vst [vmem:[%s3911_s12 + $0x30] sm:$0xff] %v1923_v11  ;;  %v1465_v35 = vadd.f32 %v2733_v14, %v1304_v10 }
 0x182   : > { %3273 = vrcp.f32 %v1799_v17  ;;  %v1800_v18 = vadd.f32 1.0, %v3264_v25  ;;  %1956 = vst [vmem:[%s3911_s12 + $0x38] sm:$0xff] %v1924_v26  ;;  %v2521_v16 = vmul.f32 -1.442695, %v1623_v29  ;;  %v2734_v33 = vpop.f32.mrb[64].mxu1  ;;  %v2846_v34 = vpop.f32.mrb[64].mxu0 }
 0x183   : > { %v1626_v31 = vadd.f32 %v2845_v23, %v1465_v35  ;;  %v2735_v22 = vpop.f32.mrb[65].mxu1  ;;  %v2847_v63 = vpop.f32.mrb[65].mxu0 }
 0x184   : > { %v3266_v36 = vpop.eup %3265  ;;  %3275 = vrcp.f32 %v1800_v18  ;;  %v2736_v38 = vadd.f32 %v2735_v22, %v2734_v33  ;;  %v2737_v43 = vpop.f32.mrb[66].mxu1  ;;  %v2848_v46 = vadd.f32 %v2847_v63, %v2846_v34 }
 0x185   : > { %v1893_v37 = vmul.f32 %v3266_v36, %v3266_v36  ;;  %3277 = vpow2.f32 %v2521_v16  ;;  %v2522_v51 = vmul.f32 -1.442695, %v1626_v31  ;;  %v2849_v42 = vpop.f32.mrb[66].mxu0  ;;  %v2738_v47 = vpop.f32.mrb[67].mxu1 }
 0x186   : > { %v2850_v48 = vpop.f32.mrb[67].mxu0  ;;  %v3268_v50 = vpop.eup %3267  ;;  %v1470_v6 = vadd.f32 %v2736_v38, %v3813_v27  ;;  %v2739_v53 = vadd.f32 %v2738_v47, %v2737_v43 }
 0x187   : > { %v1925_v52 = vmul.f32 %v1893_v37, %v1893_v37  ;;  %3279 = vpow2.f32 %v2522_v51  ;;  %v3270_v54 = vpop.eup %3269  ;;  %v1894_v32 = vmul.f32 %v3268_v50, %v3268_v50  ;;  %v2851_v57 = vadd.f32 %v2850_v48, %v2849_v42 }
 0x188   : > { %v1801_v59 = vadd.f32 1.0, %v3270_v54  ;;  %v1631_v62 = vadd.f32 %v2848_v46, %v1470_v6  ;;  %v1473_v61 = vadd.f32 %v2739_v53, %v3818_v30 }
 0x189   : > { %1957 = vst [vmem:[%s3911_s12 + $0x40] sm:$0xff] %v1925_v52  ;;  %v3272_v21 = vpop.eup %3271  ;;  %v1926_v49 = vmul.f32 %v1894_v32, %v1894_v32 }
 0x18a   : > { %3281 = vrcp.f32 %v1801_v59  ;;  %v1802_v1 = vadd.f32 1.0, %v3272_v21  ;;  %v2523_v2 = vmul.f32 -1.442695, %v1631_v62  ;;  %v1634_v3 = vadd.f32 %v2851_v57, %v1473_v61  ;;  %v2740_v4 = vpop.f32.mrb[68].mxu1  ;;  %v2852_v9 = vpop.f32.mrb[68].mxu0 }
 0x18b   : > { %1958 = vst [vmem:[%s3911_s12 + $0x48] sm:$0xff] %v1926_v49  ;;  %v2741_v27 = vpop.f32.mrb[69].mxu1  ;;  %v2853_v40 = vpop.f32.mrb[69].mxu0 }
 0x18c   : > { %v3274_v10 = vpop.eup %3273  ;;  %3283 = vrcp.f32 %v1802_v1  ;;  %v2524_v56 = vmul.f32 -1.442695, %v1634_v3  ;;  %v2742_v7 = vadd.f32 %v2741_v27, %v2740_v4  ;;  %v2743_v11 = vpop.f32.mrb[70].mxu1  ;;  %v2854_v12 = vadd.f32 %v2853_v40, %v2852_v9 }
 0x18d   : > { %v1895_v28 = vmul.f32 %v3274_v10, %v3274_v10  ;;  %v2855_v13 = vpop.f32.mrb[70].mxu0  ;;  %3285 = vpow2.f32 %v2523_v2  ;;  %v2744_v14 = vpop.f32.mrb[71].mxu1 }
 0x18e   : > { %v3276_v30 = vpop.eup %3275  ;;  %v2856_v17 = vpop.f32.mrb[71].mxu0  ;;  %3287 = vpow2.f32 %v2524_v56  ;;  %v1478_v29 = vadd.f32 %v2742_v7, %v3823_v41  ;;  %v2745_v18 = vadd.f32 %v2744_v14, %v2743_v11 }
 0x18f   : > { %v3278_v23 = vpop.eup %3277  ;;  %v1927_v25 = vmul.f32 %v1895_v28, %v1895_v28  ;;  %v1896_v26 = vmul.f32 %v3276_v30, %v3276_v30  ;;  %v2857_v16 = vadd.f32 %v2856_v17, %v2855_v13 }
 0x190   : > { %v1803_v35 = vadd.f32 1.0, %v3278_v23  ;;  %v1639_v34 = vadd.f32 %v2854_v12, %v1478_v29  ;;  %v1481_v22 = vadd.f32 %v2745_v18, %v3828_v44 }
 0x191   : > { %v3280_v31 = vpop.eup %3279  ;;  %1959 = vst [vmem:[%s3911_s12 + $0x50] sm:$0xff] %v1927_v25  ;;  %v1928_v33 = vmul.f32 %v1896_v26, %v1896_v26 }
 0x192   : > { %3289 = vrcp.f32 %v1803_v35  ;;  %v1804_v36 = vadd.f32 1.0, %v3280_v31  ;;  %v2525_v63 = vmul.f32 -1.442695, %v1639_v34  ;;  %v2746_v37 = vpop.f32.mrb[72].mxu1  ;;  %v2858_v51 = vpop.f32.mrb[72].mxu0  ;;  %v1642_v38 = vadd.f32 %v2857_v16, %v1481_v22 }
 0x193   : > { %1960 = vst [vmem:[%s3911_s12 + $0x58] sm:$0xff] %v1928_v33  ;;  %v2747_v43 = vpop.f32.mrb[73].mxu1  ;;  %v2859_v42 = vpop.f32.mrb[73].mxu0 }
 0x194   : > { %3291 = vrcp.f32 %v1804_v36  ;;  %v3282_v41 = vpop.eup %3281  ;;  %v2748_v46 = vadd.f32 %v2747_v43, %v2746_v37  ;;  %v2860_v47 = vadd.f32 %v2859_v42, %v2858_v51  ;;  %v2749_v48 = vpop.f32.mrb[74].mxu1  ;;  %v2526_v6 = vmul.f32 -1.442695, %v1642_v38 }
 0x195   : > { %3293 = vpow2.f32 %v2525_v63  ;;  %v2861_v50 = vpop.f32.mrb[74].mxu0  ;;  %v1897_v52 = vmul.f32 %v3282_v41, %v3282_v41  ;;  %v2750_v53 = vpop.f32.mrb[75].mxu1 }
 0x196   : > { %v2862_v54 = vpop.f32.mrb[75].mxu0  ;;  %v3284_v44 = vpop.eup %3283  ;;  %v1486_v32 = vadd.f32 %v2748_v46, %v3833_v55  ;;  %v2751_v57 = vadd.f32 %v2750_v53, %v2749_v48  ;;  %3295 = vpow2.f32 %v2526_v6 }
 0x197   : > { %v2863_v59 = vadd.f32 %v2862_v54, %v2861_v50  ;;  %v3286_v62 = vpop.eup %3285  ;;  %v1929_v61 = vmul.f32 %v1897_v52, %v1897_v52  ;;  %v1898_v21 = vmul.f32 %v3284_v44, %v3284_v44 }
 0x198   : > { %v3288_v49 = vpop.eup %3287  ;;  %v1805_v1 = vadd.f32 1.0, %v3286_v62  ;;  %v1647_v2 = vadd.f32 %v2860_v47, %v1486_v32  ;;  %v1489_v3 = vadd.f32 %v2751_v57, %v3838_v58 }
 0x199   : > { %1961 = vst [vmem:[%s3911_s12 + $0x60] sm:$0xff] %v1929_v61  ;;  %v1930_v4 = vmul.f32 %v1898_v21, %v1898_v21  ;;  %v1806_v9 = vadd.f32 1.0, %v3288_v49 }
 0x19a   : > { %3297 = vrcp.f32 %v1805_v1  ;;  %v2527_v10 = vmul.f32 -1.442695, %v1647_v2  ;;  %v1650_v27 = vadd.f32 %v2863_v59, %v1489_v3  ;;  %v2752_v40 = vpop.f32.mrb[76].mxu1  ;;  %v2864_v55 = vpop.f32.mrb[76].mxu0 }
 0x19b   : > { %1962 = vst [vmem:[%s3911_s12 + $0x68] sm:$0xff] %v1930_v4  ;;  %3299 = vrcp.f32 %v1806_v9  ;;  %v2753_v56 = vpop.f32.mrb[77].mxu1  ;;  %v2865_v7 = vpop.f32.mrb[77].mxu0 }
 0x19c   : > { %v3290_v28 = vpop.eup %3289  ;;  %3301 = vpow2.f32 %v2527_v10  ;;  %v2528_v13 = vmul.f32 -1.442695, %v1650_v27  ;;  %v2754_v30 = vadd.f32 %v2753_v56, %v2752_v40  ;;  %v2755_v12 = vpop.f32.mrb[78].mxu1  ;;  %v2866_v17 = vadd.f32 %v2865_v7, %v2864_v55 }
 0x19d   : > { %v1899_v11 = vmul.f32 %v3290_v28, %v3290_v28  ;;  %v2867_v58 = vpop.f32.mrb[78].mxu0  ;;  %v2756_v23 = vpop.f32.mrb[79].mxu1 }
 0x19e   : > { %v3292_v14 = vpop.eup %3291  ;;  %v2868_v25 = vpop.f32.mrb[79].mxu0  ;;  %3303 = vpow2.f32 %v2528_v13  ;;  %v1494_v18 = vadd.f32 %v2754_v30, %v3843_v5  ;;  %v2757_v31 = vadd.f32 %v2756_v23, %v2755_v12 }
 0x19f   : > { %v3294_v26 = vpop.eup %3293  ;;  %v1931_v29 = vmul.f32 %v1899_v11, %v1899_v11  ;;  %v1900_v35 = vmul.f32 %v3292_v14, %v3292_v14  ;;  %v2869_v33 = vadd.f32 %v2868_v25, %v2867_v58 }
 0x1a0   : > { %v1807_v16 = vadd.f32 1.0, %v3294_v26  ;;  %v1655_v36 = vadd.f32 %v2866_v17, %v1494_v18  ;;  %v3296_v22 = vpop.eup %3295  ;;  %v1497_v63 = vadd.f32 %v2757_v31, %v3848_v8 }
 0x1a1   : > { %1963 = vst [vmem:[%s3911_s12 + $0x70] sm:$0xff] %v1931_v29  ;;  %v1932_v34 = vmul.f32 %v1900_v35, %v1900_v35  ;;  %v1808_v37 = vadd.f32 1.0, %v3296_v22 }
 0x1a2   : > { %3305 = vrcp.f32 %v1807_v16  ;;  %v2529_v51 = vmul.f32 -1.442695, %v1655_v36  ;;  %v2758_v38 = vpop.f32.mrb[80].mxu1  ;;  %v2870_v43 = vpop.f32.mrb[80].mxu0  ;;  %v1658_v42 = vadd.f32 %v2869_v33, %v1497_v63 }
 0x1a3   : > { %1964 = vst [vmem:[%s3911_s12 + $0x78] sm:$0xff] %v1932_v34  ;;  %v2759_v41 = vpop.f32.mrb[81].mxu1  ;;  %v2871_v46 = vpop.f32.mrb[81].mxu0  ;;  %3307 = vrcp.f32 %v1808_v37 }
 0x1a4   : > { %v3298_v47 = vpop.eup %3297  ;;  %v2760_v5 = vadd.f32 %v2759_v41, %v2758_v38  ;;  %v2872_v48 = vadd.f32 %v2871_v46, %v2870_v43  ;;  %v2761_v50 = vpop.f32.mrb[82].mxu1  ;;  %3309 = vpow2.f32 %v2529_v51  ;;  %v2530_v54 = vmul.f32 -1.442695, %v1658_v42 }
 0x1a5   : > { %v2873_v52 = vpop.f32.mrb[82].mxu0  ;;  %v3300_v6 = vpop.eup %3299  ;;  %v1901_v53 = vmul.f32 %v3298_v47, %v3298_v47 }
 0x1a6   : > { %v2762_v8 = vpop.f32.mrb[83].mxu1  ;;  %v2874_v44 = vpop.f32.mrb[83].mxu0  ;;  %v1902_v57 = vmul.f32 %v3300_v6, %v3300_v6  ;;  %v1502_v59 = vadd.f32 %v2760_v5, %v3853_v20  ;;  %3311 = vpow2.f32 %v2530_v54 }
 0x1a7   : > { %v3302_v32 = vpop.eup %3301  ;;  %v2763_v62 = vadd.f32 %v2762_v8, %v2761_v50  ;;  %v2875_v61 = vadd.f32 %v2874_v44, %v2873_v52  ;;  %v1933_v21 = vmul.f32 %v1901_v53, %v1901_v53 }
 0x1a8   : > { %v1809_v49 = vadd.f32 1.0, %v3302_v32  ;;  %v3304_v1 = vpop.eup %3303  ;;  %v1934_v2 = vmul.f32 %v1902_v57, %v1902_v57  ;;  %v1663_v3 = vadd.f32 %v2872_v48, %v1502_v59 }
 0x1a9   : > { %v1505_v4 = vadd.f32 %v2763_v62, %v3858_v24  ;;  %1965 = vst [vmem:[%s3911_s12 + $0x80] sm:$0xff] %v1933_v21  ;;  %v1810_v9 = vadd.f32 1.0, %v3304_v1 }
 0x1aa   : > { %3313 = vrcp.f32 %v1809_v49  ;;  %1966 = vst [vmem:[%s3911_s12 + $0x88] sm:$0xff] %v1934_v2  ;;  %v2531_v10 = vmul.f32 -1.442695, %v1663_v3  ;;  %v2764_v40 = vpop.f32.mrb[84].mxu1  ;;  %v2876_v55 = vpop.f32.mrb[84].mxu0 }
 0x1ab   : > { %v1666_v27 = vadd.f32 %v2875_v61, %v1505_v4  ;;  %3315 = vrcp.f32 %v1810_v9  ;;  %v2765_v20 = vpop.f32.mrb[85].mxu1  ;;  %v2877_v56 = vpop.f32.mrb[85].mxu0 }
 0x1ac   : > { %v3306_v28 = vpop.eup %3305  ;;  %3317 = vpow2.f32 %v2531_v10  ;;  %v2766_v13 = vadd.f32 %v2765_v20, %v2764_v40  ;;  %v2767_v30 = vpop.f32.mrb[86].mxu1  ;;  %v2878_v24 = vadd.f32 %v2877_v56, %v2876_v55 }
 0x1ad   : > { %v1903_v7 = vmul.f32 %v3306_v28, %v3306_v28  ;;  %v2532_v11 = vmul.f32 -1.442695, %v1666_v27  ;;  %v2879_v12 = vpop.f32.mrb[86].mxu0  ;;  %v2768_v58 = vpop.f32.mrb[87].mxu1 }
 0x1ae   : > { %v2880_v14 = vpop.f32.mrb[87].mxu0  ;;  %v3308_v17 = vpop.eup %3307  ;;  %v1510_v25 = vadd.f32 %v2766_v13, %v3863_v39  ;;  %v2769_v26 = vadd.f32 %v2768_v58, %v2767_v30 }
 0x1af   : > { %v1935_v23 = vmul.f32 %v1903_v7, %v1903_v7  ;;  %3319 = vpow2.f32 %v2532_v11  ;;  %v3310_v29 = vpop.eup %3309  ;;  %v1904_v35 = vmul.f32 %v3308_v17, %v3308_v17  ;;  %v2881_v18 = vadd.f32 %v2880_v14, %v2879_v12 }
 0x1b0   : > { %v1811_v16 = vadd.f32 1.0, %v3310_v29  ;;  %v1671_v31 = vadd.f32 %v2878_v24, %v1510_v25  ;;  %v1513_v33 = vadd.f32 %v2769_v26, %v3868_v45  ;;  %v3312_v34 = vpop.eup %3311 }
 0x1b1   : > { %1967 = vst [vmem:[%s3911_s12 + $0x90] sm:$0xff] %v1935_v23  ;;  %v1936_v36 = vmul.f32 %v1904_v35, %v1904_v35  ;;  %v1812_v22 = vadd.f32 1.0, %v3312_v34 }
 0x1b2   : > { %3321 = vrcp.f32 %v1811_v16  ;;  %v2533_v63 = vmul.f32 -1.442695, %v1671_v31  ;;  %v1674_v37 = vadd.f32 %v2881_v18, %v1513_v33  ;;  %v2770_v51 = vpop.f32.mrb[88].mxu1  ;;  %v2882_v38 = vpop.f32.mrb[88].mxu0 }
 0x1b3   : > { %1968 = vst [vmem:[%s3911_s12 + $0x98] sm:$0xff] %v1936_v36  ;;  %v2771_v39 = vpop.f32.mrb[89].mxu1  ;;  %v2883_v42 = vpop.f32.mrb[89].mxu0  ;;  %3323 = vrcp.f32 %v1812_v22 }
 0x1b4   : > { %v3314_v43 = vpop.eup %3313  ;;  %v2534_v46 = vmul.f32 -1.442695, %v1674_v37  ;;  %v2772_v47 = vadd.f32 %v2771_v39, %v2770_v51  ;;  %v2773_v5 = vpop.f32.mrb[90].mxu1  ;;  %3325 = vpow2.f32 %v2533_v63  ;;  %v2884_v50 = vadd.f32 %v2883_v42, %v2882_v38 }
 0x1b5   : > { %v1905_v41 = vmul.f32 %v3314_v43, %v3314_v43  ;;  %v2885_v48 = vpop.f32.mrb[90].mxu0  ;;  %v3316_v45 = vpop.eup %3315 }
 0x1b6   : > { %v2774_v52 = vpop.f32.mrb[91].mxu1  ;;  %v2886_v6 = vpop.f32.mrb[91].mxu0  ;;  %v1906_v8 = vmul.f32 %v3316_v45, %v3316_v45  ;;  %3327 = vpow2.f32 %v2534_v46  ;;  %v1518_v44 = vadd.f32 %v2772_v47, %v3873_v60 }
 0x1b7   : > { %v3318_v53 = vpop.eup %3317  ;;  %v1937_v54 = vmul.f32 %v1905_v41, %v1905_v41  ;;  %v2775_v57 = vadd.f32 %v2774_v52, %v2773_v5  ;;  %v2887_v59 = vadd.f32 %v2886_v6, %v2885_v48 }
 0x1b8   : > { %v1813_v32 = vadd.f32 1.0, %v3318_v53  ;;  %v1938_v61 = vmul.f32 %v1906_v8, %v1906_v8  ;;  %v1679_v21 = vadd.f32 %v2884_v50, %v1518_v44 }
 0x1b9   : > { %v3320_v62 = vpop.eup %3319  ;;  %1969 = vst [vmem:[%s3911_s12 + $0xa0] sm:$0xff] %v1937_v54  ;;  %v1521_v1 = vadd.f32 %v2775_v57, %v3878_v0 }
 0x1ba   : > { %3329 = vrcp.f32 %v1813_v32  ;;  %v1814_v49 = vadd.f32 1.0, %v3320_v62  ;;  %1970 = vst [vmem:[%s3911_s12 + $0xa8] sm:$0xff] %v1938_v61  ;;  %v2535_v2 = vmul.f32 -1.442695, %v1679_v21  ;;  %v2776_v3 = vpop.f32.mrb[92].mxu1  ;;  %v2888_v4 = vpop.f32.mrb[92].mxu0 }
 0x1bb   : > { %v1682_v9 = vadd.f32 %v2887_v59, %v1521_v1  ;;  %v2777_v10 = vpop.f32.mrb[93].mxu1  ;;  %v2889_v27 = vpop.f32.mrb[93].mxu0 }
 0x1bc   : > { %3331 = vrcp.f32 %v1814_v49  ;;  %v3322_v60 = vpop.eup %3321  ;;  %v2778_v40 = vadd.f32 %v2777_v10, %v2776_v3  ;;  %v2890_v55 = vadd.f32 %v2889_v27, %v2888_v4  ;;  %v2779_v28 = vpop.f32.mrb[94].mxu1 }
 0x1bd   : > { %3333 = vpow2.f32 %v2535_v2  ;;  %v2891_v20 = vpop.f32.mrb[94].mxu0  ;;  %v1907_v56 = vmul.f32 %v3322_v60, %v3322_v60  ;;  %v2536_v7 = vmul.f32 -1.442695, %v1682_v9  ;;  %v2780_v11 = vpop.f32.mrb[95].mxu1 }
 0x1be   : > { %v2892_v13 = vpop.f32.mrb[95].mxu0  ;;  %v3324_v0 = vpop.eup %3323  ;;  %v1526_v30 = vadd.f32 %v2778_v40, %v3883_v15  ;;  %v2781_v12 = vadd.f32 %v2780_v11, %v2779_v28 }
 0x1bf   : > { %v2893_v24 = vadd.f32 %v2892_v13, %v2891_v20  ;;  %v3326_v58 = vpop.eup %3325  ;;  %v1939_v14 = vmul.f32 %v1907_v56, %v1907_v56  ;;  %v1908_v17 = vmul.f32 %v3324_v0, %v3324_v0  ;;  %3335 = vpow2.f32 %v2536_v7 }
 0x1c0   : > { %v3328_v23 = vpop.eup %3327  ;;  %v1815_v25 = vadd.f32 1.0, %v3326_v58  ;;  %v1687_v26 = vadd.f32 %v2890_v55, %v1526_v30  ;;  %v1529_v29 = vadd.f32 %v2781_v12, %v3888_v19 }
 0x1c1   : > { %1971 = vst [vmem:[%s3911_s12 + $0xb0] sm:$0xff] %v1939_v14  ;;  %v1940_v35 = vmul.f32 %v1908_v17, %v1908_v17  ;;  %v1816_v18 = vadd.f32 1.0, %v3328_v23 }
 0x1c2   : > { %3337 = vrcp.f32 %v1815_v25  ;;  %v2537_v16 = vmul.f32 -1.442695, %v1687_v26  ;;  %v1690_v31 = vadd.f32 %v2893_v24, %v1529_v29 }
 0x1c3   : > { %1972 = vst [vmem:[%s3911_s12 + $0xb8] sm:$0xff] %v1940_v35  ;;  %3339 = vrcp.f32 %v1816_v18 }
 0x1c4   : > { %v3330_v15 = vpop.eup %3329  ;;  %3341 = vpow2.f32 %v2537_v16  ;;  %v2538_v34 = vmul.f32 -1.442695, %v1690_v31 }
 0x1c5   : > { %v1909_v33 = vmul.f32 %v3330_v15, %v3330_v15 }
 0x1c6   : > { %v3332_v36 = vpop.eup %3331  ;;  %3343 = vpow2.f32 %v2538_v34 }
 0x1c7   : > { %v3334_v22 = vpop.eup %3333  ;;  %v1941_v63 = vmul.f32 %v1909_v33, %v1909_v33  ;;  %v1910_v37 = vmul.f32 %v3332_v36, %v3332_v36 }
 0x1c8   : > { %v1817_v19 = vadd.f32 1.0, %v3334_v22 }
 0x1c9   : > { %1973 = vst [vmem:[%s3911_s12 + $0xc0] sm:$0xff] %v1941_v63  ;;  %v1942_v51 = vmul.f32 %v1910_v37, %v1910_v37  ;;  %v3336_v38 = vpop.eup %3335 }
 0x1ca   : > { %3345 = vrcp.f32 %v1817_v19  ;;  %v1818_v43 = vadd.f32 1.0, %v3336_v38 }
 0x1cb   : > { %1974 = vst [vmem:[%s3911_s12 + $0xc8] sm:$0xff] %v1942_v51 }
 0x1cc   : > { %v3338_v39 = vpop.eup %3337  ;;  %3347 = vrcp.f32 %v1818_v43 }
 0x1cd   : > { %v3340_v42 = vpop.eup %3339  ;;  %v1911_v41 = vmul.f32 %v3338_v39, %v3338_v39 }
 0x1ce   : > { %v3342_v46 = vpop.eup %3341  ;;  %v1912_v47 = vmul.f32 %v3340_v42, %v3340_v42 }
 0x1cf   : > { %v1943_v5 = vmul.f32 %v1911_v41, %v1911_v41  ;;  %v1819_v48 = vadd.f32 1.0, %v3342_v46 }
 0x1d0   : > { %v3344_v45 = vpop.eup %3343  ;;  %v1944_v50 = vmul.f32 %v1912_v47, %v1912_v47 }
 0x1d1   : > { %1975 = vst [vmem:[%s3911_s12 + $0xd0] sm:$0xff] %v1943_v5  ;;  %3349 = vrcp.f32 %v1819_v48  ;;  %v1820_v52 = vadd.f32 1.0, %v3344_v45 }
 0x1d2   : > { %1976 = vst [vmem:[%s3911_s12 + $0xd8] sm:$0xff] %v1944_v50 }
 0x1d3   : > { %3351 = vrcp.f32 %v1820_v52 }
 0x1d4   : > { %v3346_v6 = vpop.eup %3345 }
 0x1d5   : > { %v1913_v53 = vmul.f32 %v3346_v6, %v3346_v6 }
 0x1d6   : > { %v3348_v54 = vpop.eup %3347 }
 0x1d7   : > { %v1945_v8 = vmul.f32 %v1913_v53, %v1913_v53  ;;  %v1914_v44 = vmul.f32 %v3348_v54, %v3348_v54 }
 0x1d9   : > { %1977 = vst [vmem:[%s3911_s12 + $0xe0] sm:$0xff] %v1945_v8  ;;  %v1946_v32 = vmul.f32 %v1914_v44, %v1914_v44 }
 0x1db   : > { %v3350_v57 = vpop.eup %3349  ;;  %1978 = vst [vmem:[%s3911_s12 + $0xe8] sm:$0xff] %v1946_v32 }
 0x1dc   : > { %v1915_v59 = vmul.f32 %v3350_v57, %v3350_v57  ;;  %1987 = sbr.rel (!%p3537_p5) target bundleno = 539 (0x21b), region = 36 }
 0x1dd   : > { %v3352_v62 = vpop.eup %3351 }
 0x1de   : > { %v1947_v61 = vmul.f32 %v1915_v59, %v1915_v59  ;;  %v1916_v21 = vmul.f32 %v3352_v62, %v3352_v62 }
 0x1e0   : > { %1979 = vst [vmem:[%s3911_s12 + $0xf0] sm:$0xff] %v1947_v61  ;;  %v1948_v49 = vmul.f32 %v1916_v21, %v1916_v21 }
 0x1e2   : > { %1980 = vst [vmem:[%s3911_s12 + $0xf8] sm:$0xff] %v1948_v49 }
 0x1e3   : > { %s4147_s9 = smov (!%p1990_p11, %s1989_s9), 32 }
 0x1e4   : > { %s2541_s24 = sshll.u32 %s4147_s9, 7 }
 0x1e5   : > { %p2544_p12 = scmp.eq.s32.totalorder %s2541_s24, 0 }
 0x1e6   : > { %s3987_s23 = sshrl.u32 (!%p2544_p12), %s4147_s9, 5 }
 0x1e7   : > { %2000 = sbr.rel (%p2544_p12) target bundleno = 539 (0x21b), region = 40  ;;  %p2545_p13 = scmp.le.s32.totalorder (!%p2544_p12), %s3987_s23, 0 }
 0x1ee   : > { %2293 = sbr.rel (%p2545_p13) target bundleno = 518 (0x206), region = 119  ;;  %s4129_s15 = smov (!%p2545_p13), %s3984_s28 }
 0x1ef   : > { %s4130_s30 = smov (!%p2545_p13), %s3911_s12  ;;  %s3996_s29 = smov (!%p2545_p13), 0  }
 0x1f0   : > { %s3998_s4 = smov (!%p2545_p13), 0  }
 0x1f5 LB: >> { %v2124_v1 = vld [vmem:[%s3447_s30] sm:$0xff]  ;;  %v2126_v2 = vld [vmem:[%s3447_s30 + $0x8] sm:$0xff]  ;;  %v2128_v3 = vld [vmem:[%s3447_s30 + $0x10] sm:$0xff]  ;;  %s2188_s5 = sadd.s32 1, %s3451_s29  ;;  %s2118_s4 = sadd.s32 1, %s3455_s4   ;;  %s3455_s4 = sphi %s3998_s4, %s2118_s4   ;;  %s3451_s29 = sphi %s3996_s29, %s4133_s29   ;;  %s3447_s30 = sphi %s4130_s30, %s4132_s30   ;;  %s3443_s15 = sphi %s4129_s15, %s4131_s15  }
 0x1f6   : >> { %2125 = vst [vmem:[%s3443_s15] sm:$0xff] %v2124_v1  ;;  %2127 = vst [vmem:[%s3443_s15 + $0x8] sm:$0xff] %v2126_v2  ;;  %v2130_v4 = vld [vmem:[%s3447_s30 + $0x18] sm:$0xff]  ;;  %v2132_v9 = vld [vmem:[%s3447_s30 + $0x20] sm:$0xff]  ;;  %p2189_p0 = scmp.ge.s32.totalorder %s2188_s5, %s3987_s23  ;;  %p2117_p1 = scmp.ge.s32.totalorder %s2118_s4, %s3987_s23 }
 0x1f7   : >> { %2129 = vst [vmem:[%s3443_s15 + $0x10] sm:$0xff] %v2128_v3  ;;  %v2134_v10 = vld [vmem:[%s3447_s30 + $0x28] sm:$0xff]  ;;  %2131 = vst [vmem:[%s3443_s15 + $0x18] sm:$0xff] %v2130_v4  ;;  %v2136_v27 = vld [vmem:[%s3447_s30 + $0x30] sm:$0xff] }
 0x1f8   : >> { %2133 = vst [vmem:[%s3443_s15 + $0x20] sm:$0xff] %v2132_v9  ;;  %2135 = vst [vmem:[%s3443_s15 + $0x28] sm:$0xff] %v2134_v10  ;;  %v2138_v60 = vld [vmem:[%s3447_s30 + $0x38] sm:$0xff]  ;;  %v2140_v40 = vld [vmem:[%s3447_s30 + $0x40] sm:$0xff]  ;;  %s4149_s5 = smov (%p2189_p0, %s2188_s5), 0 }
 0x1f9   : >> { %2137 = vst [vmem:[%s3443_s15 + $0x30] sm:$0xff] %v2136_v27  ;;  %2139 = vst [vmem:[%s3443_s15 + $0x38] sm:$0xff] %v2138_v60  ;;  %v2142_v55 = vld [vmem:[%s3447_s30 + $0x48] sm:$0xff]  ;;  %v2144_v28 = vld [vmem:[%s3447_s30 + $0x50] sm:$0xff]  ;;  %s2546_s6 = sshll.u32 %s4149_s5, 8  ;;  %s4133_s29 = smov %s4149_s5 }
 0x1fa   : >> { %2141 = vst [vmem:[%s3443_s15 + $0x40] sm:$0xff] %v2140_v40  ;;  %v2146_v20 = vld [vmem:[%s3447_s30 + $0x58] sm:$0xff]  ;;  %2143 = vst [vmem:[%s3443_s15 + $0x48] sm:$0xff] %v2142_v55  ;;  %v2148_v56 = vld [vmem:[%s3447_s30 + $0x60] sm:$0xff]  ;;  %s4054_s7 = scalar_lea.vmem %s3911_s12, %s2546_s6 [#allocation2]   ;;  %s2194_s8 = scalar_lea.vmem %s3984_s28, %s2546_s6  }
 0x1fb   : >> { %2145 = vst [vmem:[%s3443_s15 + $0x50] sm:$0xff] %v2144_v28  ;;  %2147 = vst [vmem:[%s3443_s15 + $0x58] sm:$0xff] %v2146_v20  ;;  %v2150_v7 = vld [vmem:[%s3447_s30 + $0x68] sm:$0xff]  ;;  %v2152_v11 = vld [vmem:[%s3447_s30 + $0x70] sm:$0xff] }
 0x1fc   : >> { %2149 = vst [vmem:[%s3443_s15 + $0x60] sm:$0xff] %v2148_v56  ;;  %2151 = vst [vmem:[%s3443_s15 + $0x68] sm:$0xff] %v2150_v7  ;;  %v2154_v13 = vld [vmem:[%s3447_s30 + $0x78] sm:$0xff]  ;;  %v2156_v0 = vld [vmem:[%s3447_s30 + $0x80] sm:$0xff] }
 0x1fd   : >> { %2153 = vst [vmem:[%s3443_s15 + $0x70] sm:$0xff] %v2152_v11  ;;  %v2158_v30 = vld [vmem:[%s3447_s30 + $0x88] sm:$0xff]  ;;  %2155 = vst [vmem:[%s3443_s15 + $0x78] sm:$0xff] %v2154_v13  ;;  %v2160_v12 = vld [vmem:[%s3447_s30 + $0x90] sm:$0xff] }
 0x1fe   : >> { %2157 = vst [vmem:[%s3443_s15 + $0x80] sm:$0xff] %v2156_v0  ;;  %2159 = vst [vmem:[%s3443_s15 + $0x88] sm:$0xff] %v2158_v30  ;;  %v2162_v24 = vld [vmem:[%s3447_s30 + $0x98] sm:$0xff]  ;;  %v2164_v58 = vld [vmem:[%s3447_s30 + $0xa0] sm:$0xff] }
 0x1ff   : >> { %2161 = vst [vmem:[%s3443_s15 + $0x90] sm:$0xff] %v2160_v12  ;;  %2163 = vst [vmem:[%s3443_s15 + $0x98] sm:$0xff] %v2162_v24  ;;  %v2166_v14 = vld [vmem:[%s3447_s30 + $0xa8] sm:$0xff]  ;;  %v2168_v17 = vld [vmem:[%s3447_s30 + $0xb0] sm:$0xff]  ;;  %2120 = sbr.rel (!%p2117_p1) target bundleno = 501 (0x1f5), region = 125 }
 0x200   : >> { %2165 = vst [vmem:[%s3443_s15 + $0xa0] sm:$0xff] %v2164_v58  ;;  %v2170_v23 = vld [vmem:[%s3447_s30 + $0xb8] sm:$0xff]  ;;  %2167 = vst [vmem:[%s3443_s15 + $0xa8] sm:$0xff] %v2166_v14  ;;  %v2172_v25 = vld [vmem:[%s3447_s30 + $0xc0] sm:$0xff] }
 0x201   : >> { %2169 = vst [vmem:[%s3443_s15 + $0xb0] sm:$0xff] %v2168_v17  ;;  %2171 = vst [vmem:[%s3443_s15 + $0xb8] sm:$0xff] %v2170_v23  ;;  %v2174_v26 = vld [vmem:[%s3447_s30 + $0xc8] sm:$0xff]  ;;  %v2176_v29 = vld [vmem:[%s3447_s30 + $0xd0] sm:$0xff] }
 0x202   : >> { %2173 = vst [vmem:[%s3443_s15 + $0xc0] sm:$0xff] %v2172_v25  ;;  %2175 = vst [vmem:[%s3443_s15 + $0xc8] sm:$0xff] %v2174_v26  ;;  %v2178_v35 = vld [vmem:[%s3447_s30 + $0xd8] sm:$0xff]  ;;  %v2180_v18 = vld [vmem:[%s3447_s30 + $0xe0] sm:$0xff] }
 0x203   : >> { %2177 = vst [vmem:[%s3443_s15 + $0xd0] sm:$0xff] %v2176_v29  ;;  %v2182_v16 = vld [vmem:[%s3447_s30 + $0xe8] sm:$0xff]  ;;  %2179 = vst [vmem:[%s3443_s15 + $0xd8] sm:$0xff] %v2178_v35  ;;  %v2184_v31 = vld [vmem:[%s3447_s30 + $0xf0] sm:$0xff] }
 0x204   : >> { %2181 = vst [vmem:[%s3443_s15 + $0xe0] sm:$0xff] %v2180_v18  ;;  %2183 = vst [vmem:[%s3443_s15 + $0xe8] sm:$0xff] %v2182_v16  ;;  %v2186_v15 = vld [vmem:[%s3447_s30 + $0xf8] sm:$0xff]  ;;  %s4132_s30 = smov %s4054_s7 }
 0x205   : >> { %2185 = vst [vmem:[%s3443_s15 + $0xf0] sm:$0xff] %v2184_v31  ;;  %2187 = vst [vmem:[%s3443_s15 + $0xf8] sm:$0xff] %v2186_v15  ;;  %s4131_s15 = smov %s2194_s8 }
 0x206 PF: > { %s4095_s10 = sand.u32 31, %s4147_s9   ;;  %s2556_s21 = sshll.u32 %s3987_s23, 8 }
 0x207   : > { %s2199_s11 = scalar_lea.vmem %s3911_s12, %s2556_s21 [#allocation2]   ;;  %s2201_s14 = scalar_lea.vmem %s3984_s28, %s2556_s21  }
 0x208   : > { %p2551_p2 = scmp.le.s32.totalorder %s4095_s10, 0 }
 0x209   : > { %s3457_s22 = smov (!%p2551_p2), %s2201_s14   ;;  %s3461_s24 = smov (!%p2551_p2), %s2199_s11  }
 0x20a   : > { %2307 = sbr.rel (%p2551_p2) target bundleno = 539 (0x21b), region = 130  ;;  %s3465_s25 = smov (!%p2551_p2), 0  }
 0x20b   : > { %s3469_s26 = smov (!%p2551_p2), 0  }
 0x211 LB: >> { %v2211_v33 = vld [vmem:[%s3463_s24] sm:$0xff]  ;;  %s2213_s9 = sadd.s32 1, %s3467_s25  ;;  %s2205_s26 = sadd.s32 1, %s3471_s26   ;;  %s3471_s26 = sphi %s3469_s26, %s2205_s26   ;;  %s3467_s25 = sphi %s3465_s25, %s3466_s25   ;;  %s3463_s24 = sphi %s3461_s24, %s2218_s24   ;;  %s3459_s22 = sphi %s3457_s22, %s2219_s22  }
 0x212   : >> { %2212 = vst [vmem:[%s3459_s22] sm:$0xff] %v2211_v33  ;;  %p2214_p3 = scmp.ge.s32.totalorder %s2213_s9, %s4095_s10  ;;  %p2204_p4 = scmp.ge.s32.totalorder %s2205_s26, %s4095_s10 }
 0x214   : >> { %s4151_s9 = smov (%p2214_p3, %s2213_s9), 0  ;;  %2207 = sbr.rel (!%p2204_p4) target bundleno = 529 (0x211), region = 136 }
 0x215   : >> { %s2552_s12 = sshll.u32 %s4151_s9, 3  ;;  %s3466_s25 = smov %s4151_s9  }
 0x216   : >> { %s2218_s24 = scalar_lea.vmem %s2199_s11, %s2552_s12 [#allocation2]   ;;  %s2219_s22 = scalar_lea.vmem %s2201_s14, %s2552_s12  }
 0x21b PF: > { %s13_s18 = sadd.s32 1, %s3439_s18   ;;  %s4134_s12 = smov %s3419_s13 }
 0x21c   : > { %p10_p5 = scmp.ge.s32.totalorder %s13_s18, 6   ;;  %s4135_s13 = smov %s3548_s27 }
 0x21d   : > { %s4136_s14 = smov %s3431_s16  ;;  %s4137_s15 = smov %s3435_s17 }
 0x21e   : > { %s4138_s16 = smov %s4141_s19  ;;  %s4139_s17 = smov %s4145_s20 }
 0x21f   :  { %12 = sbr.rel (!%p10_p5) target bundleno = 4 (0x4), region = 147 }

</bundles_post_ra>
